<compile_context>
chip_gen: v7x
topology: tpu7x:2x2x1
jax: 0.10.0
libtpu: 0.0.40
codegen_flags: <defaults>
</compile_context>

<pallas_src>
import jax
import jax.numpy as jnp
from jax.experimental import pallas as pl
from jax.experimental.pallas import tpu as pltpu


def _bcast_mul_kernel(scale_ref, x_ref, o_ref):
    # scale_ref: (tile, 1), x_ref: (tile, HW) -> broadcast multiply on the VPU.
    o_ref[...] = x_ref[...] * scale_ref[...]


def _num_tensorcores():
    """Best-effort TensorCore count per chip (2 on v7x, 1 on v5e/v6e)."""
    try:
        kind = jax.devices()[0].device_kind.lower()
    except Exception:
        return 1
    return 2 if "v7" in kind else 1


def _pick_tiling(rows, dtype, preferred_steps):
    """Pick (tile, steps) with the FEWEST grid steps.

    Order of preference: `preferred_steps` (== #TensorCores, so each core gets
    exactly one step on v7x), then a single full-array step.  The row tile must
    be a multiple of the packed-sublane count for `dtype` (8 for 4-byte, 16 for
    2-byte, 32 for 1-byte) unless it equals the full row extent.
    """
    itemsize = jnp.dtype(dtype).itemsize
    sub = {4: 8, 2: 16, 1: 32}.get(itemsize, 8)
    for steps in dict.fromkeys((preferred_steps, 1)):
        if steps >= 1 and rows % steps == 0:
            tile = rows // steps
            if tile % sub == 0 or steps == 1:
                return tile, steps
    return rows, 1  # single full-array block is always legal


def broadcast_mul(x441, x436):
    """Computes x441 * x436 where x441 is (N, C, 1, 1) and x436 is (N, C, H, W)."""
    n, c, h, w = x436.shape
    assert x441.shape == (n, c, 1, 1)
    rows = n * c
    hw = h * w

    x2d = x436.reshape(rows, hw)                      # (N*C, H*W)
    s2d = x441.reshape(rows, 1).astype(x436.dtype)    # (N*C, 1)

    tile, steps = _pick_tiling(rows, x436.dtype, _num_tensorcores())
    grid = (steps,)

    out2d = pl.pallas_call(
        _bcast_mul_kernel,
        out_shape=jax.ShapeDtypeStruct((rows, hw), x436.dtype),
        grid=grid,
        in_specs=[
            pl.BlockSpec((tile, 1), lambda i: (i, 0)),    # scale tile per step
            pl.BlockSpec((tile, hw), lambda i: (i, 0)),   # activation tile
        ],
        out_specs=pl.BlockSpec((tile, hw), lambda i: (i, 0)),
        compiler_params=pltpu.CompilerParams(
            # Neutral on 1-TC chips; lets v7x shard the 2 steps across its TCs.
            dimension_semantics=("parallel",),
        ),
    )(s2d, x2d)

    return out2d.reshape(n, c, h, w)


if __name__ == "__main__":
    key = jax.random.PRNGKey(0)
    k1, k2 = jax.random.split(key)
    # Shapes match the PyTorch module: x436 (1,1824,7,7), x441 (1,1824,1,1)
    x436 = jax.random.normal(k1, (1, 1824, 7, 7), dtype=jnp.float32)
    x441 = jax.random.normal(k2, (1, 1824, 1, 1), dtype=jnp.float32)

    out = broadcast_mul(x441, x436)
    out = jax.block_until_ready(out)

    # Correctness check against plain JAX broadcasting semantics.
    ref = x441 * x436
    assert out.shape == (1, 1824, 7, 7)
    assert jnp.allclose(out, ref), "mismatch vs reference"

    print("KERNEL_OK")
</pallas_src>

<mosaic_0001>
module attributes {stable_mosaic.version = 11 : i64} {
  func.func @_bcast_mul_kernel(%arg0: i32, %arg1: memref<1824x1xf32, #tpu.memory_space<vmem>>, %arg2: memref<1824x49xf32, #tpu.memory_space<vmem>>, %arg3: memref<1824x49xf32, #tpu.memory_space<vmem>>) attributes {dimension_semantics = [#tpu.dimension_semantics<parallel>], iteration_bounds = array<i64: 1>, scalar_prefetch = 0 : i64, scratch_operands = 0 : i64, tpu.core_type = #tpu.core_type<tc>, window_params = [{transform_indices = @transform_0, window_bounds = array<i64: 1824, 1>}, {transform_indices = @transform_1, window_bounds = array<i64: 1824, 49>}, {transform_indices = @transform_2, window_bounds = array<i64: 1824, 49>}]} {
    %c0 = arith.constant 0 : index
    %c0_0 = arith.constant 0 : index
    %0 = vector.load %arg2[%c0, %c0_0] : memref<1824x49xf32, #tpu.memory_space<vmem>>, vector<1824x49xf32>
    %c0_1 = arith.constant 0 : index
    %c0_2 = arith.constant 0 : index
    %1 = vector.load %arg1[%c0_1, %c0_2] : memref<1824x1xf32, #tpu.memory_space<vmem>>, vector<1824x1xf32>
    %2 = vector.broadcast %1 : vector<1824x1xf32> to vector<1824x49xf32>
    %3 = arith.mulf %0, %2 : vector<1824x49xf32>
    %c0_3 = arith.constant 0 : index
    %c0_4 = arith.constant 0 : index
    %4 = vector.load %arg3[%c0_3, %c0_4] : memref<1824x49xf32, #tpu.memory_space<vmem>>, vector<1824x49xf32>
    tpu.vector_store %arg3[%c0_3, %c0_4], %3 {strides = array<i32>} : memref<1824x49xf32, #tpu.memory_space<vmem>>, vector<1824x49xf32>,
    return
  }
  func.func @transform_0(%arg0: i32) -> (i32, i32) {
    %c0_i32 = arith.constant 0 : i32
    %c0_i32_0 = arith.constant 0 : i32
    return %arg0, %c0_i32 : i32, i32
  }
  func.func @transform_1(%arg0: i32) -> (i32, i32) {
    %c0_i32 = arith.constant 0 : i32
    %c0_i32_0 = arith.constant 0 : i32
    return %arg0, %c0_i32 : i32, i32
  }
  func.func @transform_2(%arg0: i32) -> (i32, i32) {
    %c0_i32 = arith.constant 0 : i32
    %c0_i32_0 = arith.constant 0 : i32
    return %arg0, %c0_i32 : i32, i32
  }
}

</mosaic_0001>

<bundles_post_ra>
// kernel: tpu_custom_call.1
= control target key start
LH: loop header
LB: loop body
LE: loop exit
PB: predicated region body
PF: predicated region fallthrough
CT: control target
= control target key end

     0   :  { %v2071_v0 = vmov 0   ;;  %vm1835_vm0 = vcmask 400384   ;;  %s4367_s0 = inlined_call_operand.vmem [shape: f32[1824,1], index: 0, kind: input, shape index: {}]   ;;  %s4368_s1 = inlined_call_operand.vmem [shape: f32[1824,49], index: 1, kind: input, shape index: {}]   ;;  %s4369_s2 = inlined_call_operand.vmem [shape: f32[1824,49], index: 2, kind: output, shape index: {}]  }
   0x1   :  { %2070 = vset.pattern.permute.xlu1 %v2071_v0  ;;  %2069 = vset.pattern.permute.xlu0 %v2071_v0  ;;  %v241_v1 = vld [vmem:[%s4367_s0 + $0x10] sm:$0xff]  ;;  %v239_v2 = vld [vmem:[%s4367_s0] sm:$0xff]  ;;  %v242_v3 = vld [vmem:[%s4367_s0 + $0x18] sm:$0xff] }
   0x2   :  { %479 = vperm.xlu1 %2070, %v241_v1   ;;  %469 = vperm.xlu0 %2069, %v239_v2   ;;  %v240_v4 = vld [vmem:[%s4367_s0 + $0x8] sm:$0xff]  ;;  %v243_v6 = vld [vmem:[%s4367_s0 + $0x20] sm:$0xff]  ;;  %v246_v7 = vld [vmem:[%s4367_s0 + $0x38] sm:$0xff] }
   0x3   :  { %v244_v5 = vld [vmem:[%s4367_s0 + $0x28] sm:$0xff]  ;;  %v245_v8 = vld [vmem:[%s4367_s0 + $0x30] sm:$0xff]  ;;  %v247_v10 = vld [vmem:[%s4367_s0 + $0x40] sm:$0xff] }
   0x4   :  { %v248_v9 = vld [vmem:[%s4367_s0 + $0x48] sm:$0xff]  ;;  %v250_v11 = vld [vmem:[%s4367_s0 + $0x58] sm:$0xff]  ;;  %v249_v12 = vld [vmem:[%s4367_s0 + $0x50] sm:$0xff] }
   0x5   :  { %v252_v13 = vld [vmem:[%s4367_s0 + $0x68] sm:$0xff]  ;;  %v251_v14 = vld [vmem:[%s4367_s0 + $0x60] sm:$0xff]  ;;  %v254_v15 = vld [vmem:[%s4367_s0 + $0x78] sm:$0xff] }
   0x6   :  { %484 = vperm.xlu1 %2070, %v242_v3   ;;  %474 = vperm.xlu0 %2069, %v240_v4   ;;  %v253_v16 = vld [vmem:[%s4367_s0 + $0x70] sm:$0xff]  ;;  %v256_v17 = vld [vmem:[%s4367_s0 + $0x88] sm:$0xff]  ;;  %v255_v18 = vld [vmem:[%s4367_s0 + $0x80] sm:$0xff] }
   0x7   :  { %v258_v19 = vld [vmem:[%s4367_s0 + $0x98] sm:$0xff]  ;;  %v257_v20 = vld [vmem:[%s4367_s0 + $0x90] sm:$0xff]  ;;  %v260_v21 = vld [vmem:[%s4367_s0 + $0xa8] sm:$0xff] }
   0x8   :  { %v259_v22 = vld [vmem:[%s4367_s0 + $0xa0] sm:$0xff]  ;;  %v262_v23 = vld [vmem:[%s4367_s0 + $0xb8] sm:$0xff]  ;;  %v261_v24 = vld [vmem:[%s4367_s0 + $0xb0] sm:$0xff] }
   0x9   :  { %v264_v25 = vld [vmem:[%s4367_s0 + $0xc8] sm:$0xff]  ;;  %v263_v26 = vld [vmem:[%s4367_s0 + $0xc0] sm:$0xff]  ;;  %v266_v27 = vld [vmem:[%s4367_s0 + $0xd8] sm:$0xff] }
   0xa   :  { %494 = vperm.xlu1 %2070, %v244_v5   ;;  %489 = vperm.xlu0 %2069, %v243_v6   ;;  %v265_v28 = vld [vmem:[%s4367_s0 + $0xd0] sm:$0xff]  ;;  %v268_v29 = vld [vmem:[%s4367_s0 + $0xe8] sm:$0xff]  ;;  %v267_v30 = vld [vmem:[%s4367_s0 + $0xe0] sm:$0xff] }
   0xb   :  { %v270_v31 = vld [vmem:[%s4367_s0 + $0xf8] sm:$0xff]  ;;  %v269_v32 = vld [vmem:[%s4367_s0 + $0xf0] sm:$0xff]  ;;  %v272_v33 = vld [vmem:[%s4367_s0 + $0x108] sm:$0xff] }
   0xc   :  { %v271_v34 = vld [vmem:[%s4367_s0 + $0x100] sm:$0xff]  ;;  %v274_v35 = vld [vmem:[%s4367_s0 + $0x118] sm:$0xff]  ;;  %v273_v36 = vld [vmem:[%s4367_s0 + $0x110] sm:$0xff] }
   0xd   :  { %v276_v37 = vld [vmem:[%s4367_s0 + $0x128] sm:$0xff]  ;;  %v275_v38 = vld [vmem:[%s4367_s0 + $0x120] sm:$0xff]  ;;  %v278_v39 = vld [vmem:[%s4367_s0 + $0x138] sm:$0xff] }
   0xe   :  { %504 = vperm.xlu1 %2070, %v246_v7   ;;  %499 = vperm.xlu0 %2069, %v245_v8   ;;  %v277_v40 = vld [vmem:[%s4367_s0 + $0x130] sm:$0xff]  ;;  %v280_v41 = vld [vmem:[%s4367_s0 + $0x148] sm:$0xff]  ;;  %v279_v42 = vld [vmem:[%s4367_s0 + $0x140] sm:$0xff] }
   0xf   :  { %v282_v43 = vld [vmem:[%s4367_s0 + $0x158] sm:$0xff]  ;;  %v281_v44 = vld [vmem:[%s4367_s0 + $0x150] sm:$0xff]  ;;  %v284_v45 = vld [vmem:[%s4367_s0 + $0x168] sm:$0xff] }
  0x10   :  { %v283_v46 = vld [vmem:[%s4367_s0 + $0x160] sm:$0xff]  ;;  %v286_v47 = vld [vmem:[%s4367_s0 + $0x178] sm:$0xff]  ;;  %v285_v48 = vld [vmem:[%s4367_s0 + $0x170] sm:$0xff] }
  0x11   :  { %v288_v49 = vld [vmem:[%s4367_s0 + $0x188] sm:$0xff]  ;;  %v287_v50 = vld [vmem:[%s4367_s0 + $0x180] sm:$0xff]  ;;  %v290_v51 = vld [vmem:[%s4367_s0 + $0x198] sm:$0xff] }
  0x12   :  { %514 = vperm.xlu1 %2070, %v248_v9   ;;  %509 = vperm.xlu0 %2069, %v247_v10   ;;  %v289_v52 = vld [vmem:[%s4367_s0 + $0x190] sm:$0xff]  ;;  %v292_v53 = vld [vmem:[%s4367_s0 + $0x1a8] sm:$0xff]  ;;  %v291_v54 = vld [vmem:[%s4367_s0 + $0x1a0] sm:$0xff] }
  0x13   :  { %v294_v55 = vld [vmem:[%s4367_s0 + $0x1b8] sm:$0xff]  ;;  %v293_v56 = vld [vmem:[%s4367_s0 + $0x1b0] sm:$0xff]  ;;  %v296_v57 = vld [vmem:[%s4367_s0 + $0x1c8] sm:$0xff] }
  0x14   :  { %v295_v58 = vld [vmem:[%s4367_s0 + $0x1c0] sm:$0xff]  ;;  %v298_v59 = vld [vmem:[%s4367_s0 + $0x1d8] sm:$0xff]  ;;  %v297_v60 = vld [vmem:[%s4367_s0 + $0x1d0] sm:$0xff] }
  0x15   :  { %v300_v61 = vld [vmem:[%s4367_s0 + $0x1e8] sm:$0xff]  ;;  %v299_v62 = vld [vmem:[%s4367_s0 + $0x1e0] sm:$0xff]  ;;  %v302_v63 = vld [vmem:[%s4367_s0 + $0x1f8] sm:$0xff] }
  0x16   :  { %524 = vperm.xlu1 %2070, %v250_v11   ;;  %519 = vperm.xlu0 %2069, %v249_v12   ;;  %v301_v0 = vld [vmem:[%s4367_s0 + $0x1f0] sm:$0xff]  ;;  %v11_v2 = vld [vmem:[%s4368_s1] sm:$0xff]  ;;  %v304_v3 = vld [vmem:[%s4367_s0 + $0x208] sm:$0xff] }
  0x17   :  { %v13_v1 = vld [vmem:[%s4368_s1 + $0x10] sm:$0xff]  ;;  %v303_v4 = vld [vmem:[%s4367_s0 + $0x200] sm:$0xff]  ;;  %v14_v9 = vld [vmem:[%s4368_s1 + $0x18] sm:$0xff] }
  0x18   :  { %v12_v10 = vld [vmem:[%s4368_s1 + $0x8] sm:$0xff]  ;;  %v306_v11 = vld [vmem:[%s4367_s0 + $0x218] sm:$0xff]  ;;  %v305_v12 = vld [vmem:[%s4367_s0 + $0x210] sm:$0xff] }
  0x1a   :  { %534 = vperm.xlu1 %2070, %v252_v13   ;;  %529 = vperm.xlu0 %2069, %v251_v14  }
  0x1e   :  { %544 = vperm.xlu1 %2070, %v254_v15   ;;  %539 = vperm.xlu0 %2069, %v253_v16  }
  0x22   :  { %554 = vperm.xlu1 %2070, %v256_v17   ;;  %549 = vperm.xlu0 %2069, %v255_v18   ;;  %v16_v17 = vld [vmem:[%s4368_s1 + $0x28] sm:$0xff]  ;;  %v15_v18 = vld [vmem:[%s4368_s1 + $0x20] sm:$0xff] }
  0x26   :  { %564 = vperm.xlu1 %2070, %v258_v19   ;;  %559 = vperm.xlu0 %2069, %v257_v20   ;;  %v308_v19 = vld [vmem:[%s4367_s0 + $0x228] sm:$0xff]  ;;  %v307_v20 = vld [vmem:[%s4367_s0 + $0x220] sm:$0xff] }
  0x2a   :  { %574 = vperm.xlu1 %2070, %v260_v21   ;;  %569 = vperm.xlu0 %2069, %v259_v22  }
  0x2e   :  { %584 = vperm.xlu1 %2070, %v262_v23   ;;  %579 = vperm.xlu0 %2069, %v261_v24  }
  0x32   :  { %594 = vperm.xlu1 %2070, %v264_v25   ;;  %589 = vperm.xlu0 %2069, %v263_v26   ;;  %v18_v25 = vld [vmem:[%s4368_s1 + $0x38] sm:$0xff]  ;;  %v17_v26 = vld [vmem:[%s4368_s1 + $0x30] sm:$0xff] }
  0x36   :  { %604 = vperm.xlu1 %2070, %v266_v27   ;;  %599 = vperm.xlu0 %2069, %v265_v28   ;;  %v310_v27 = vld [vmem:[%s4367_s0 + $0x238] sm:$0xff]  ;;  %v309_v28 = vld [vmem:[%s4367_s0 + $0x230] sm:$0xff] }
  0x3a   :  { %614 = vperm.xlu1 %2070, %v268_v29   ;;  %609 = vperm.xlu0 %2069, %v267_v30  }
  0x3e   :  { %624 = vperm.xlu1 %2070, %v270_v31   ;;  %619 = vperm.xlu0 %2069, %v269_v32  }
  0x42   :  { %634 = vperm.xlu1 %2070, %v272_v33   ;;  %629 = vperm.xlu0 %2069, %v271_v34   ;;  %v20_v33 = vld [vmem:[%s4368_s1 + $0x48] sm:$0xff]  ;;  %v19_v34 = vld [vmem:[%s4368_s1 + $0x40] sm:$0xff] }
  0x46   :  { %644 = vperm.xlu1 %2070, %v274_v35   ;;  %639 = vperm.xlu0 %2069, %v273_v36   ;;  %v312_v35 = vld [vmem:[%s4367_s0 + $0x248] sm:$0xff]  ;;  %v311_v36 = vld [vmem:[%s4367_s0 + $0x240] sm:$0xff] }
  0x4a   :  { %654 = vperm.xlu1 %2070, %v276_v37   ;;  %649 = vperm.xlu0 %2069, %v275_v38  }
  0x4e   :  { %664 = vperm.xlu1 %2070, %v278_v39   ;;  %659 = vperm.xlu0 %2069, %v277_v40  }
  0x52   :  { %674 = vperm.xlu1 %2070, %v280_v41   ;;  %669 = vperm.xlu0 %2069, %v279_v42   ;;  %v22_v41 = vld [vmem:[%s4368_s1 + $0x58] sm:$0xff]  ;;  %v21_v42 = vld [vmem:[%s4368_s1 + $0x50] sm:$0xff] }
  0x56   :  { %684 = vperm.xlu1 %2070, %v282_v43   ;;  %679 = vperm.xlu0 %2069, %v281_v44   ;;  %v314_v43 = vld [vmem:[%s4367_s0 + $0x258] sm:$0xff]  ;;  %v313_v44 = vld [vmem:[%s4367_s0 + $0x250] sm:$0xff] }
  0x5a   :  { %694 = vperm.xlu1 %2070, %v284_v45   ;;  %689 = vperm.xlu0 %2069, %v283_v46  }
  0x5e   :  { %704 = vperm.xlu1 %2070, %v286_v47   ;;  %699 = vperm.xlu0 %2069, %v285_v48  }
  0x62   :  { %714 = vperm.xlu1 %2070, %v288_v49   ;;  %709 = vperm.xlu0 %2069, %v287_v50   ;;  %v24_v49 = vld [vmem:[%s4368_s1 + $0x68] sm:$0xff]  ;;  %v23_v50 = vld [vmem:[%s4368_s1 + $0x60] sm:$0xff] }
  0x66   :  { %724 = vperm.xlu1 %2070, %v290_v51   ;;  %719 = vperm.xlu0 %2069, %v289_v52   ;;  %v316_v51 = vld [vmem:[%s4367_s0 + $0x268] sm:$0xff]  ;;  %v315_v52 = vld [vmem:[%s4367_s0 + $0x260] sm:$0xff] }
  0x6a   :  { %734 = vperm.xlu1 %2070, %v292_v53   ;;  %729 = vperm.xlu0 %2069, %v291_v54  }
  0x6e   :  { %744 = vperm.xlu1 %2070, %v294_v55   ;;  %739 = vperm.xlu0 %2069, %v293_v56  }
  0x72   :  { %754 = vperm.xlu1 %2070, %v296_v57   ;;  %749 = vperm.xlu0 %2069, %v295_v58   ;;  %v26_v57 = vld [vmem:[%s4368_s1 + $0x78] sm:$0xff]  ;;  %v25_v58 = vld [vmem:[%s4368_s1 + $0x70] sm:$0xff] }
  0x76   :  { %764 = vperm.xlu1 %2070, %v298_v59   ;;  %759 = vperm.xlu0 %2069, %v297_v60   ;;  %v318_v59 = vld [vmem:[%s4367_s0 + $0x278] sm:$0xff]  ;;  %v317_v60 = vld [vmem:[%s4367_s0 + $0x270] sm:$0xff] }
  0x7a   :  { %774 = vperm.xlu1 %2070, %v300_v61   ;;  %769 = vperm.xlu0 %2069, %v299_v62  }
  0x7e   :  { %784 = vperm.xlu1 %2070, %v302_v63   ;;  %779 = vperm.xlu0 %2069, %v301_v0  }
  0x81   :  { %v480_v5 = vpop.permute.xlu1 %479  ;;  %v470_v6 = vpop.permute.xlu0 %469 }
  0x82   :  { %v1609_v7 = vmul.f32 %v480_v5, %v13_v1  ;;  %v1607_v8 = vmul.f32 %v470_v6, %v11_v2  ;;  %794 = vperm.xlu1 %2070, %v304_v3   ;;  %789 = vperm.xlu0 %2069, %v303_v4   ;;  %v28_v1 = vld [vmem:[%s4368_s1 + $0x88] sm:$0xff]  ;;  %v27_v2 = vld [vmem:[%s4368_s1 + $0x80] sm:$0xff] }
  0x83   :  { %v320_v3 = vld [vmem:[%s4367_s0 + $0x288] sm:$0xff]  ;;  %v319_v4 = vld [vmem:[%s4367_s0 + $0x280] sm:$0xff] }
  0x84   :  { %1838 = vst.msk [vmem:[%s4369_s2 + $0x10] sm:$0xff] %vm1835_vm0, %v1609_v7  ;;  %1836 = vst.msk [vmem:[%s4369_s2] sm:$0xff] %vm1835_vm0, %v1607_v8 }
  0x85   :  { %v485_v13 = vpop.permute.xlu1 %484  ;;  %v475_v14 = vpop.permute.xlu0 %474 }
  0x86   :  { %v1610_v15 = vmul.f32 %v485_v13, %v14_v9  ;;  %v1608_v16 = vmul.f32 %v475_v14, %v12_v10  ;;  %804 = vperm.xlu1 %2070, %v306_v11   ;;  %799 = vperm.xlu0 %2069, %v305_v12   ;;  %v30_v9 = vld [vmem:[%s4368_s1 + $0x98] sm:$0xff]  ;;  %v29_v10 = vld [vmem:[%s4368_s1 + $0x90] sm:$0xff] }
  0x87   :  { %v322_v11 = vld [vmem:[%s4367_s0 + $0x298] sm:$0xff]  ;;  %v321_v12 = vld [vmem:[%s4367_s0 + $0x290] sm:$0xff] }
  0x88   :  { %1839 = vst.msk [vmem:[%s4369_s2 + $0x18] sm:$0xff] %vm1835_vm0, %v1610_v15  ;;  %1837 = vst.msk [vmem:[%s4369_s2 + $0x8] sm:$0xff] %vm1835_vm0, %v1608_v16 }
  0x89   :  { %v495_v21 = vpop.permute.xlu1 %494  ;;  %v490_v22 = vpop.permute.xlu0 %489 }
  0x8a   :  { %v1612_v23 = vmul.f32 %v495_v21, %v16_v17  ;;  %v1611_v24 = vmul.f32 %v490_v22, %v15_v18  ;;  %814 = vperm.xlu1 %2070, %v308_v19   ;;  %809 = vperm.xlu0 %2069, %v307_v20   ;;  %v32_v17 = vld [vmem:[%s4368_s1 + $0xa8] sm:$0xff]  ;;  %v31_v18 = vld [vmem:[%s4368_s1 + $0xa0] sm:$0xff] }
  0x8b   :  { %v324_v19 = vld [vmem:[%s4367_s0 + $0x2a8] sm:$0xff]  ;;  %v323_v20 = vld [vmem:[%s4367_s0 + $0x2a0] sm:$0xff] }
  0x8c   :  { %1841 = vst.msk [vmem:[%s4369_s2 + $0x28] sm:$0xff] %vm1835_vm0, %v1612_v23  ;;  %1840 = vst.msk [vmem:[%s4369_s2 + $0x20] sm:$0xff] %vm1835_vm0, %v1611_v24 }
  0x8d   :  { %v505_v29 = vpop.permute.xlu1 %504  ;;  %v500_v30 = vpop.permute.xlu0 %499 }
  0x8e   :  { %v1614_v31 = vmul.f32 %v505_v29, %v18_v25  ;;  %v1613_v32 = vmul.f32 %v500_v30, %v17_v26  ;;  %824 = vperm.xlu1 %2070, %v310_v27   ;;  %819 = vperm.xlu0 %2069, %v309_v28   ;;  %v34_v25 = vld [vmem:[%s4368_s1 + $0xb8] sm:$0xff]  ;;  %v33_v26 = vld [vmem:[%s4368_s1 + $0xb0] sm:$0xff] }
  0x8f   :  { %v326_v27 = vld [vmem:[%s4367_s0 + $0x2b8] sm:$0xff]  ;;  %v325_v28 = vld [vmem:[%s4367_s0 + $0x2b0] sm:$0xff] }
  0x90   :  { %1843 = vst.msk [vmem:[%s4369_s2 + $0x38] sm:$0xff] %vm1835_vm0, %v1614_v31  ;;  %1842 = vst.msk [vmem:[%s4369_s2 + $0x30] sm:$0xff] %vm1835_vm0, %v1613_v32 }
  0x91   :  { %v515_v37 = vpop.permute.xlu1 %514  ;;  %v510_v38 = vpop.permute.xlu0 %509 }
  0x92   :  { %v1616_v39 = vmul.f32 %v515_v37, %v20_v33  ;;  %v1615_v40 = vmul.f32 %v510_v38, %v19_v34  ;;  %834 = vperm.xlu1 %2070, %v312_v35   ;;  %829 = vperm.xlu0 %2069, %v311_v36   ;;  %v36_v33 = vld [vmem:[%s4368_s1 + $0xc8] sm:$0xff]  ;;  %v35_v34 = vld [vmem:[%s4368_s1 + $0xc0] sm:$0xff] }
  0x93   :  { %v328_v35 = vld [vmem:[%s4367_s0 + $0x2c8] sm:$0xff]  ;;  %v327_v36 = vld [vmem:[%s4367_s0 + $0x2c0] sm:$0xff] }
  0x94   :  { %1845 = vst.msk [vmem:[%s4369_s2 + $0x48] sm:$0xff] %vm1835_vm0, %v1616_v39  ;;  %1844 = vst.msk [vmem:[%s4369_s2 + $0x40] sm:$0xff] %vm1835_vm0, %v1615_v40 }
  0x95   :  { %v525_v45 = vpop.permute.xlu1 %524  ;;  %v520_v46 = vpop.permute.xlu0 %519 }
  0x96   :  { %v1618_v47 = vmul.f32 %v525_v45, %v22_v41  ;;  %v1617_v48 = vmul.f32 %v520_v46, %v21_v42  ;;  %844 = vperm.xlu1 %2070, %v314_v43   ;;  %839 = vperm.xlu0 %2069, %v313_v44   ;;  %v38_v41 = vld [vmem:[%s4368_s1 + $0xd8] sm:$0xff]  ;;  %v37_v42 = vld [vmem:[%s4368_s1 + $0xd0] sm:$0xff] }
  0x97   :  { %v330_v43 = vld [vmem:[%s4367_s0 + $0x2d8] sm:$0xff]  ;;  %v329_v44 = vld [vmem:[%s4367_s0 + $0x2d0] sm:$0xff] }
  0x98   :  { %1847 = vst.msk [vmem:[%s4369_s2 + $0x58] sm:$0xff] %vm1835_vm0, %v1618_v47  ;;  %1846 = vst.msk [vmem:[%s4369_s2 + $0x50] sm:$0xff] %vm1835_vm0, %v1617_v48 }
  0x99   :  { %v535_v53 = vpop.permute.xlu1 %534  ;;  %v530_v54 = vpop.permute.xlu0 %529 }
  0x9a   :  { %v1620_v55 = vmul.f32 %v535_v53, %v24_v49  ;;  %v1619_v56 = vmul.f32 %v530_v54, %v23_v50  ;;  %854 = vperm.xlu1 %2070, %v316_v51   ;;  %849 = vperm.xlu0 %2069, %v315_v52   ;;  %v40_v49 = vld [vmem:[%s4368_s1 + $0xe8] sm:$0xff]  ;;  %v39_v50 = vld [vmem:[%s4368_s1 + $0xe0] sm:$0xff] }
  0x9b   :  { %v332_v51 = vld [vmem:[%s4367_s0 + $0x2e8] sm:$0xff]  ;;  %v331_v52 = vld [vmem:[%s4367_s0 + $0x2e0] sm:$0xff] }
  0x9c   :  { %1849 = vst.msk [vmem:[%s4369_s2 + $0x68] sm:$0xff] %vm1835_vm0, %v1620_v55  ;;  %1848 = vst.msk [vmem:[%s4369_s2 + $0x60] sm:$0xff] %vm1835_vm0, %v1619_v56 }
  0x9d   :  { %v545_v61 = vpop.permute.xlu1 %544  ;;  %v540_v62 = vpop.permute.xlu0 %539 }
  0x9e   :  { %v1622_v63 = vmul.f32 %v545_v61, %v26_v57  ;;  %v1621_v0 = vmul.f32 %v540_v62, %v25_v58  ;;  %864 = vperm.xlu1 %2070, %v318_v59   ;;  %859 = vperm.xlu0 %2069, %v317_v60   ;;  %v42_v57 = vld [vmem:[%s4368_s1 + $0xf8] sm:$0xff]  ;;  %v41_v58 = vld [vmem:[%s4368_s1 + $0xf0] sm:$0xff] }
  0x9f   :  { %v334_v59 = vld [vmem:[%s4367_s0 + $0x2f8] sm:$0xff]  ;;  %v333_v60 = vld [vmem:[%s4367_s0 + $0x2f0] sm:$0xff] }
  0xa0   :  { %1851 = vst.msk [vmem:[%s4369_s2 + $0x78] sm:$0xff] %vm1835_vm0, %v1622_v63  ;;  %1850 = vst.msk [vmem:[%s4369_s2 + $0x70] sm:$0xff] %vm1835_vm0, %v1621_v0 }
  0xa1   :  { %v555_v5 = vpop.permute.xlu1 %554  ;;  %v550_v6 = vpop.permute.xlu0 %549 }
  0xa2   :  { %v1624_v7 = vmul.f32 %v555_v5, %v28_v1  ;;  %v1623_v8 = vmul.f32 %v550_v6, %v27_v2  ;;  %874 = vperm.xlu1 %2070, %v320_v3   ;;  %869 = vperm.xlu0 %2069, %v319_v4   ;;  %v44_v1 = vld [vmem:[%s4368_s1 + $0x108] sm:$0xff]  ;;  %v43_v2 = vld [vmem:[%s4368_s1 + $0x100] sm:$0xff] }
  0xa3   :  { %v336_v3 = vld [vmem:[%s4367_s0 + $0x308] sm:$0xff]  ;;  %v335_v4 = vld [vmem:[%s4367_s0 + $0x300] sm:$0xff] }
  0xa4   :  { %1853 = vst.msk [vmem:[%s4369_s2 + $0x88] sm:$0xff] %vm1835_vm0, %v1624_v7  ;;  %1852 = vst.msk [vmem:[%s4369_s2 + $0x80] sm:$0xff] %vm1835_vm0, %v1623_v8 }
  0xa5   :  { %v565_v13 = vpop.permute.xlu1 %564  ;;  %v560_v14 = vpop.permute.xlu0 %559 }
  0xa6   :  { %v1626_v15 = vmul.f32 %v565_v13, %v30_v9  ;;  %v1625_v16 = vmul.f32 %v560_v14, %v29_v10  ;;  %884 = vperm.xlu1 %2070, %v322_v11   ;;  %879 = vperm.xlu0 %2069, %v321_v12   ;;  %v46_v9 = vld [vmem:[%s4368_s1 + $0x118] sm:$0xff]  ;;  %v45_v10 = vld [vmem:[%s4368_s1 + $0x110] sm:$0xff] }
  0xa7   :  { %v338_v11 = vld [vmem:[%s4367_s0 + $0x318] sm:$0xff]  ;;  %v337_v12 = vld [vmem:[%s4367_s0 + $0x310] sm:$0xff] }
  0xa8   :  { %1855 = vst.msk [vmem:[%s4369_s2 + $0x98] sm:$0xff] %vm1835_vm0, %v1626_v15  ;;  %1854 = vst.msk [vmem:[%s4369_s2 + $0x90] sm:$0xff] %vm1835_vm0, %v1625_v16 }
  0xa9   :  { %v575_v21 = vpop.permute.xlu1 %574  ;;  %v570_v22 = vpop.permute.xlu0 %569 }
  0xaa   :  { %v1628_v23 = vmul.f32 %v575_v21, %v32_v17  ;;  %v1627_v24 = vmul.f32 %v570_v22, %v31_v18  ;;  %894 = vperm.xlu1 %2070, %v324_v19   ;;  %889 = vperm.xlu0 %2069, %v323_v20   ;;  %v48_v17 = vld [vmem:[%s4368_s1 + $0x128] sm:$0xff]  ;;  %v47_v18 = vld [vmem:[%s4368_s1 + $0x120] sm:$0xff] }
  0xab   :  { %v340_v19 = vld [vmem:[%s4367_s0 + $0x328] sm:$0xff]  ;;  %v339_v20 = vld [vmem:[%s4367_s0 + $0x320] sm:$0xff] }
  0xac   :  { %1857 = vst.msk [vmem:[%s4369_s2 + $0xa8] sm:$0xff] %vm1835_vm0, %v1628_v23  ;;  %1856 = vst.msk [vmem:[%s4369_s2 + $0xa0] sm:$0xff] %vm1835_vm0, %v1627_v24 }
  0xad   :  { %v585_v29 = vpop.permute.xlu1 %584  ;;  %v580_v30 = vpop.permute.xlu0 %579 }
  0xae   :  { %v1630_v31 = vmul.f32 %v585_v29, %v34_v25  ;;  %v1629_v32 = vmul.f32 %v580_v30, %v33_v26  ;;  %904 = vperm.xlu1 %2070, %v326_v27   ;;  %899 = vperm.xlu0 %2069, %v325_v28   ;;  %v50_v25 = vld [vmem:[%s4368_s1 + $0x138] sm:$0xff]  ;;  %v49_v26 = vld [vmem:[%s4368_s1 + $0x130] sm:$0xff] }
  0xaf   :  { %v342_v27 = vld [vmem:[%s4367_s0 + $0x338] sm:$0xff]  ;;  %v341_v28 = vld [vmem:[%s4367_s0 + $0x330] sm:$0xff] }
  0xb0   :  { %1859 = vst.msk [vmem:[%s4369_s2 + $0xb8] sm:$0xff] %vm1835_vm0, %v1630_v31  ;;  %1858 = vst.msk [vmem:[%s4369_s2 + $0xb0] sm:$0xff] %vm1835_vm0, %v1629_v32 }
  0xb1   :  { %v595_v37 = vpop.permute.xlu1 %594  ;;  %v590_v38 = vpop.permute.xlu0 %589 }
  0xb2   :  { %v1632_v39 = vmul.f32 %v595_v37, %v36_v33  ;;  %v1631_v40 = vmul.f32 %v590_v38, %v35_v34  ;;  %914 = vperm.xlu1 %2070, %v328_v35   ;;  %909 = vperm.xlu0 %2069, %v327_v36   ;;  %v52_v33 = vld [vmem:[%s4368_s1 + $0x148] sm:$0xff]  ;;  %v51_v34 = vld [vmem:[%s4368_s1 + $0x140] sm:$0xff] }
  0xb3   :  { %v344_v35 = vld [vmem:[%s4367_s0 + $0x348] sm:$0xff]  ;;  %v343_v36 = vld [vmem:[%s4367_s0 + $0x340] sm:$0xff] }
  0xb4   :  { %1861 = vst.msk [vmem:[%s4369_s2 + $0xc8] sm:$0xff] %vm1835_vm0, %v1632_v39  ;;  %1860 = vst.msk [vmem:[%s4369_s2 + $0xc0] sm:$0xff] %vm1835_vm0, %v1631_v40 }
  0xb5   :  { %v605_v45 = vpop.permute.xlu1 %604  ;;  %v600_v46 = vpop.permute.xlu0 %599 }
  0xb6   :  { %v1634_v47 = vmul.f32 %v605_v45, %v38_v41  ;;  %v1633_v48 = vmul.f32 %v600_v46, %v37_v42  ;;  %924 = vperm.xlu1 %2070, %v330_v43   ;;  %919 = vperm.xlu0 %2069, %v329_v44   ;;  %v54_v41 = vld [vmem:[%s4368_s1 + $0x158] sm:$0xff]  ;;  %v53_v42 = vld [vmem:[%s4368_s1 + $0x150] sm:$0xff] }
  0xb7   :  { %v346_v43 = vld [vmem:[%s4367_s0 + $0x358] sm:$0xff]  ;;  %v345_v44 = vld [vmem:[%s4367_s0 + $0x350] sm:$0xff] }
  0xb8   :  { %1863 = vst.msk [vmem:[%s4369_s2 + $0xd8] sm:$0xff] %vm1835_vm0, %v1634_v47  ;;  %1862 = vst.msk [vmem:[%s4369_s2 + $0xd0] sm:$0xff] %vm1835_vm0, %v1633_v48 }
  0xb9   :  { %v615_v53 = vpop.permute.xlu1 %614  ;;  %v610_v54 = vpop.permute.xlu0 %609 }
  0xba   :  { %v1636_v55 = vmul.f32 %v615_v53, %v40_v49  ;;  %v1635_v56 = vmul.f32 %v610_v54, %v39_v50  ;;  %934 = vperm.xlu1 %2070, %v332_v51   ;;  %929 = vperm.xlu0 %2069, %v331_v52   ;;  %v56_v49 = vld [vmem:[%s4368_s1 + $0x168] sm:$0xff]  ;;  %v55_v50 = vld [vmem:[%s4368_s1 + $0x160] sm:$0xff] }
  0xbb   :  { %v348_v51 = vld [vmem:[%s4367_s0 + $0x368] sm:$0xff]  ;;  %v347_v52 = vld [vmem:[%s4367_s0 + $0x360] sm:$0xff] }
  0xbc   :  { %1865 = vst.msk [vmem:[%s4369_s2 + $0xe8] sm:$0xff] %vm1835_vm0, %v1636_v55  ;;  %1864 = vst.msk [vmem:[%s4369_s2 + $0xe0] sm:$0xff] %vm1835_vm0, %v1635_v56 }
  0xbd   :  { %v625_v61 = vpop.permute.xlu1 %624  ;;  %v620_v62 = vpop.permute.xlu0 %619 }
  0xbe   :  { %v1638_v63 = vmul.f32 %v625_v61, %v42_v57  ;;  %v1637_v0 = vmul.f32 %v620_v62, %v41_v58  ;;  %944 = vperm.xlu1 %2070, %v334_v59   ;;  %939 = vperm.xlu0 %2069, %v333_v60   ;;  %v58_v57 = vld [vmem:[%s4368_s1 + $0x178] sm:$0xff]  ;;  %v57_v58 = vld [vmem:[%s4368_s1 + $0x170] sm:$0xff] }
  0xbf   :  { %v350_v59 = vld [vmem:[%s4367_s0 + $0x378] sm:$0xff]  ;;  %v349_v60 = vld [vmem:[%s4367_s0 + $0x370] sm:$0xff] }
  0xc0   :  { %1867 = vst.msk [vmem:[%s4369_s2 + $0xf8] sm:$0xff] %vm1835_vm0, %v1638_v63  ;;  %1866 = vst.msk [vmem:[%s4369_s2 + $0xf0] sm:$0xff] %vm1835_vm0, %v1637_v0 }
  0xc1   :  { %v635_v5 = vpop.permute.xlu1 %634  ;;  %v630_v6 = vpop.permute.xlu0 %629 }
  0xc2   :  { %v1640_v7 = vmul.f32 %v635_v5, %v44_v1  ;;  %v1639_v8 = vmul.f32 %v630_v6, %v43_v2  ;;  %954 = vperm.xlu1 %2070, %v336_v3   ;;  %949 = vperm.xlu0 %2069, %v335_v4   ;;  %v60_v1 = vld [vmem:[%s4368_s1 + $0x188] sm:$0xff]  ;;  %v59_v2 = vld [vmem:[%s4368_s1 + $0x180] sm:$0xff] }
  0xc3   :  { %v352_v3 = vld [vmem:[%s4367_s0 + $0x388] sm:$0xff]  ;;  %v351_v4 = vld [vmem:[%s4367_s0 + $0x380] sm:$0xff] }
  0xc4   :  { %1869 = vst.msk [vmem:[%s4369_s2 + $0x108] sm:$0xff] %vm1835_vm0, %v1640_v7  ;;  %1868 = vst.msk [vmem:[%s4369_s2 + $0x100] sm:$0xff] %vm1835_vm0, %v1639_v8 }
  0xc5   :  { %v645_v13 = vpop.permute.xlu1 %644  ;;  %v640_v14 = vpop.permute.xlu0 %639 }
  0xc6   :  { %v1642_v15 = vmul.f32 %v645_v13, %v46_v9  ;;  %v1641_v16 = vmul.f32 %v640_v14, %v45_v10  ;;  %964 = vperm.xlu1 %2070, %v338_v11   ;;  %959 = vperm.xlu0 %2069, %v337_v12   ;;  %v62_v9 = vld [vmem:[%s4368_s1 + $0x198] sm:$0xff]  ;;  %v61_v10 = vld [vmem:[%s4368_s1 + $0x190] sm:$0xff] }
  0xc7   :  { %v354_v11 = vld [vmem:[%s4367_s0 + $0x398] sm:$0xff]  ;;  %v353_v12 = vld [vmem:[%s4367_s0 + $0x390] sm:$0xff] }
  0xc8   :  { %1871 = vst.msk [vmem:[%s4369_s2 + $0x118] sm:$0xff] %vm1835_vm0, %v1642_v15  ;;  %1870 = vst.msk [vmem:[%s4369_s2 + $0x110] sm:$0xff] %vm1835_vm0, %v1641_v16 }
  0xc9   :  { %v655_v21 = vpop.permute.xlu1 %654  ;;  %v650_v22 = vpop.permute.xlu0 %649 }
  0xca   :  { %v1644_v23 = vmul.f32 %v655_v21, %v48_v17  ;;  %v1643_v24 = vmul.f32 %v650_v22, %v47_v18  ;;  %974 = vperm.xlu1 %2070, %v340_v19   ;;  %969 = vperm.xlu0 %2069, %v339_v20   ;;  %v64_v17 = vld [vmem:[%s4368_s1 + $0x1a8] sm:$0xff]  ;;  %v63_v18 = vld [vmem:[%s4368_s1 + $0x1a0] sm:$0xff] }
  0xcb   :  { %v356_v19 = vld [vmem:[%s4367_s0 + $0x3a8] sm:$0xff]  ;;  %v355_v20 = vld [vmem:[%s4367_s0 + $0x3a0] sm:$0xff] }
  0xcc   :  { %1873 = vst.msk [vmem:[%s4369_s2 + $0x128] sm:$0xff] %vm1835_vm0, %v1644_v23  ;;  %1872 = vst.msk [vmem:[%s4369_s2 + $0x120] sm:$0xff] %vm1835_vm0, %v1643_v24 }
  0xcd   :  { %v665_v29 = vpop.permute.xlu1 %664  ;;  %v660_v30 = vpop.permute.xlu0 %659 }
  0xce   :  { %v1646_v31 = vmul.f32 %v665_v29, %v50_v25  ;;  %v1645_v32 = vmul.f32 %v660_v30, %v49_v26  ;;  %984 = vperm.xlu1 %2070, %v342_v27   ;;  %979 = vperm.xlu0 %2069, %v341_v28   ;;  %v66_v25 = vld [vmem:[%s4368_s1 + $0x1b8] sm:$0xff]  ;;  %v65_v26 = vld [vmem:[%s4368_s1 + $0x1b0] sm:$0xff] }
  0xcf   :  { %v358_v27 = vld [vmem:[%s4367_s0 + $0x3b8] sm:$0xff]  ;;  %v357_v28 = vld [vmem:[%s4367_s0 + $0x3b0] sm:$0xff] }
  0xd0   :  { %1875 = vst.msk [vmem:[%s4369_s2 + $0x138] sm:$0xff] %vm1835_vm0, %v1646_v31  ;;  %1874 = vst.msk [vmem:[%s4369_s2 + $0x130] sm:$0xff] %vm1835_vm0, %v1645_v32 }
  0xd1   :  { %v675_v37 = vpop.permute.xlu1 %674  ;;  %v670_v38 = vpop.permute.xlu0 %669 }
  0xd2   :  { %v1648_v39 = vmul.f32 %v675_v37, %v52_v33  ;;  %v1647_v40 = vmul.f32 %v670_v38, %v51_v34  ;;  %994 = vperm.xlu1 %2070, %v344_v35   ;;  %989 = vperm.xlu0 %2069, %v343_v36   ;;  %v68_v33 = vld [vmem:[%s4368_s1 + $0x1c8] sm:$0xff]  ;;  %v67_v34 = vld [vmem:[%s4368_s1 + $0x1c0] sm:$0xff] }
  0xd3   :  { %v360_v35 = vld [vmem:[%s4367_s0 + $0x3c8] sm:$0xff]  ;;  %v359_v36 = vld [vmem:[%s4367_s0 + $0x3c0] sm:$0xff] }
  0xd4   :  { %1877 = vst.msk [vmem:[%s4369_s2 + $0x148] sm:$0xff] %vm1835_vm0, %v1648_v39  ;;  %1876 = vst.msk [vmem:[%s4369_s2 + $0x140] sm:$0xff] %vm1835_vm0, %v1647_v40 }
  0xd5   :  { %v685_v45 = vpop.permute.xlu1 %684  ;;  %v680_v46 = vpop.permute.xlu0 %679 }
  0xd6   :  { %v1650_v47 = vmul.f32 %v685_v45, %v54_v41  ;;  %v1649_v48 = vmul.f32 %v680_v46, %v53_v42  ;;  %1004 = vperm.xlu1 %2070, %v346_v43   ;;  %999 = vperm.xlu0 %2069, %v345_v44   ;;  %v70_v41 = vld [vmem:[%s4368_s1 + $0x1d8] sm:$0xff]  ;;  %v69_v42 = vld [vmem:[%s4368_s1 + $0x1d0] sm:$0xff] }
  0xd7   :  { %v362_v43 = vld [vmem:[%s4367_s0 + $0x3d8] sm:$0xff]  ;;  %v361_v44 = vld [vmem:[%s4367_s0 + $0x3d0] sm:$0xff] }
  0xd8   :  { %1879 = vst.msk [vmem:[%s4369_s2 + $0x158] sm:$0xff] %vm1835_vm0, %v1650_v47  ;;  %1878 = vst.msk [vmem:[%s4369_s2 + $0x150] sm:$0xff] %vm1835_vm0, %v1649_v48 }
  0xd9   :  { %v695_v53 = vpop.permute.xlu1 %694  ;;  %v690_v54 = vpop.permute.xlu0 %689 }
  0xda   :  { %v1652_v55 = vmul.f32 %v695_v53, %v56_v49  ;;  %v1651_v56 = vmul.f32 %v690_v54, %v55_v50  ;;  %1014 = vperm.xlu1 %2070, %v348_v51   ;;  %1009 = vperm.xlu0 %2069, %v347_v52   ;;  %v72_v49 = vld [vmem:[%s4368_s1 + $0x1e8] sm:$0xff]  ;;  %v71_v50 = vld [vmem:[%s4368_s1 + $0x1e0] sm:$0xff] }
  0xdb   :  { %v364_v51 = vld [vmem:[%s4367_s0 + $0x3e8] sm:$0xff]  ;;  %v363_v52 = vld [vmem:[%s4367_s0 + $0x3e0] sm:$0xff] }
  0xdc   :  { %1881 = vst.msk [vmem:[%s4369_s2 + $0x168] sm:$0xff] %vm1835_vm0, %v1652_v55  ;;  %1880 = vst.msk [vmem:[%s4369_s2 + $0x160] sm:$0xff] %vm1835_vm0, %v1651_v56 }
  0xdd   :  { %v705_v61 = vpop.permute.xlu1 %704  ;;  %v700_v62 = vpop.permute.xlu0 %699 }
  0xde   :  { %v1654_v63 = vmul.f32 %v705_v61, %v58_v57  ;;  %v1653_v0 = vmul.f32 %v700_v62, %v57_v58  ;;  %1024 = vperm.xlu1 %2070, %v350_v59   ;;  %1019 = vperm.xlu0 %2069, %v349_v60   ;;  %v74_v57 = vld [vmem:[%s4368_s1 + $0x1f8] sm:$0xff]  ;;  %v73_v58 = vld [vmem:[%s4368_s1 + $0x1f0] sm:$0xff] }
  0xdf   :  { %v366_v59 = vld [vmem:[%s4367_s0 + $0x3f8] sm:$0xff]  ;;  %v365_v60 = vld [vmem:[%s4367_s0 + $0x3f0] sm:$0xff] }
  0xe0   :  { %1883 = vst.msk [vmem:[%s4369_s2 + $0x178] sm:$0xff] %vm1835_vm0, %v1654_v63  ;;  %1882 = vst.msk [vmem:[%s4369_s2 + $0x170] sm:$0xff] %vm1835_vm0, %v1653_v0 }
  0xe1   :  { %v715_v5 = vpop.permute.xlu1 %714  ;;  %v710_v6 = vpop.permute.xlu0 %709 }
  0xe2   :  { %v1656_v7 = vmul.f32 %v715_v5, %v60_v1  ;;  %v1655_v8 = vmul.f32 %v710_v6, %v59_v2  ;;  %1034 = vperm.xlu1 %2070, %v352_v3   ;;  %1029 = vperm.xlu0 %2069, %v351_v4   ;;  %v76_v1 = vld [vmem:[%s4368_s1 + $0x208] sm:$0xff]  ;;  %v75_v2 = vld [vmem:[%s4368_s1 + $0x200] sm:$0xff] }
  0xe3   :  { %v368_v3 = vld [vmem:[%s4367_s0 + $0x408] sm:$0xff]  ;;  %v367_v4 = vld [vmem:[%s4367_s0 + $0x400] sm:$0xff] }
  0xe4   :  { %1885 = vst.msk [vmem:[%s4369_s2 + $0x188] sm:$0xff] %vm1835_vm0, %v1656_v7  ;;  %1884 = vst.msk [vmem:[%s4369_s2 + $0x180] sm:$0xff] %vm1835_vm0, %v1655_v8 }
  0xe5   :  { %v725_v13 = vpop.permute.xlu1 %724  ;;  %v720_v14 = vpop.permute.xlu0 %719 }
  0xe6   :  { %v1658_v15 = vmul.f32 %v725_v13, %v62_v9  ;;  %v1657_v16 = vmul.f32 %v720_v14, %v61_v10  ;;  %1044 = vperm.xlu1 %2070, %v354_v11   ;;  %1039 = vperm.xlu0 %2069, %v353_v12   ;;  %v78_v9 = vld [vmem:[%s4368_s1 + $0x218] sm:$0xff]  ;;  %v77_v10 = vld [vmem:[%s4368_s1 + $0x210] sm:$0xff] }
  0xe7   :  { %v370_v11 = vld [vmem:[%s4367_s0 + $0x418] sm:$0xff]  ;;  %v369_v12 = vld [vmem:[%s4367_s0 + $0x410] sm:$0xff] }
  0xe8   :  { %1887 = vst.msk [vmem:[%s4369_s2 + $0x198] sm:$0xff] %vm1835_vm0, %v1658_v15  ;;  %1886 = vst.msk [vmem:[%s4369_s2 + $0x190] sm:$0xff] %vm1835_vm0, %v1657_v16 }
  0xe9   :  { %v735_v21 = vpop.permute.xlu1 %734  ;;  %v730_v22 = vpop.permute.xlu0 %729 }
  0xea   :  { %v1660_v23 = vmul.f32 %v735_v21, %v64_v17  ;;  %v1659_v24 = vmul.f32 %v730_v22, %v63_v18  ;;  %1054 = vperm.xlu1 %2070, %v356_v19   ;;  %1049 = vperm.xlu0 %2069, %v355_v20   ;;  %v80_v17 = vld [vmem:[%s4368_s1 + $0x228] sm:$0xff]  ;;  %v79_v18 = vld [vmem:[%s4368_s1 + $0x220] sm:$0xff] }
  0xeb   :  { %v372_v19 = vld [vmem:[%s4367_s0 + $0x428] sm:$0xff]  ;;  %v371_v20 = vld [vmem:[%s4367_s0 + $0x420] sm:$0xff] }
  0xec   :  { %1889 = vst.msk [vmem:[%s4369_s2 + $0x1a8] sm:$0xff] %vm1835_vm0, %v1660_v23  ;;  %1888 = vst.msk [vmem:[%s4369_s2 + $0x1a0] sm:$0xff] %vm1835_vm0, %v1659_v24 }
  0xed   :  { %v745_v29 = vpop.permute.xlu1 %744  ;;  %v740_v30 = vpop.permute.xlu0 %739 }
  0xee   :  { %v1662_v31 = vmul.f32 %v745_v29, %v66_v25  ;;  %v1661_v32 = vmul.f32 %v740_v30, %v65_v26  ;;  %1064 = vperm.xlu1 %2070, %v358_v27   ;;  %1059 = vperm.xlu0 %2069, %v357_v28   ;;  %v82_v25 = vld [vmem:[%s4368_s1 + $0x238] sm:$0xff]  ;;  %v81_v26 = vld [vmem:[%s4368_s1 + $0x230] sm:$0xff] }
  0xef   :  { %v374_v27 = vld [vmem:[%s4367_s0 + $0x438] sm:$0xff]  ;;  %v373_v28 = vld [vmem:[%s4367_s0 + $0x430] sm:$0xff] }
  0xf0   :  { %1891 = vst.msk [vmem:[%s4369_s2 + $0x1b8] sm:$0xff] %vm1835_vm0, %v1662_v31  ;;  %1890 = vst.msk [vmem:[%s4369_s2 + $0x1b0] sm:$0xff] %vm1835_vm0, %v1661_v32 }
  0xf1   :  { %v755_v37 = vpop.permute.xlu1 %754  ;;  %v750_v38 = vpop.permute.xlu0 %749 }
  0xf2   :  { %v1664_v39 = vmul.f32 %v755_v37, %v68_v33  ;;  %v1663_v40 = vmul.f32 %v750_v38, %v67_v34  ;;  %1074 = vperm.xlu1 %2070, %v360_v35   ;;  %1069 = vperm.xlu0 %2069, %v359_v36   ;;  %v84_v33 = vld [vmem:[%s4368_s1 + $0x248] sm:$0xff]  ;;  %v83_v34 = vld [vmem:[%s4368_s1 + $0x240] sm:$0xff] }
  0xf3   :  { %v376_v35 = vld [vmem:[%s4367_s0 + $0x448] sm:$0xff]  ;;  %v375_v36 = vld [vmem:[%s4367_s0 + $0x440] sm:$0xff] }
  0xf4   :  { %1893 = vst.msk [vmem:[%s4369_s2 + $0x1c8] sm:$0xff] %vm1835_vm0, %v1664_v39  ;;  %1892 = vst.msk [vmem:[%s4369_s2 + $0x1c0] sm:$0xff] %vm1835_vm0, %v1663_v40 }
  0xf5   :  { %v765_v45 = vpop.permute.xlu1 %764  ;;  %v760_v46 = vpop.permute.xlu0 %759 }
  0xf6   :  { %v1666_v47 = vmul.f32 %v765_v45, %v70_v41  ;;  %v1665_v48 = vmul.f32 %v760_v46, %v69_v42  ;;  %1084 = vperm.xlu1 %2070, %v362_v43   ;;  %1079 = vperm.xlu0 %2069, %v361_v44   ;;  %v86_v41 = vld [vmem:[%s4368_s1 + $0x258] sm:$0xff]  ;;  %v85_v42 = vld [vmem:[%s4368_s1 + $0x250] sm:$0xff] }
  0xf7   :  { %v378_v43 = vld [vmem:[%s4367_s0 + $0x458] sm:$0xff]  ;;  %v377_v44 = vld [vmem:[%s4367_s0 + $0x450] sm:$0xff] }
  0xf8   :  { %1895 = vst.msk [vmem:[%s4369_s2 + $0x1d8] sm:$0xff] %vm1835_vm0, %v1666_v47  ;;  %1894 = vst.msk [vmem:[%s4369_s2 + $0x1d0] sm:$0xff] %vm1835_vm0, %v1665_v48 }
  0xf9   :  { %v775_v53 = vpop.permute.xlu1 %774  ;;  %v770_v54 = vpop.permute.xlu0 %769 }
  0xfa   :  { %v1668_v55 = vmul.f32 %v775_v53, %v72_v49  ;;  %v1667_v56 = vmul.f32 %v770_v54, %v71_v50  ;;  %1094 = vperm.xlu1 %2070, %v364_v51   ;;  %1089 = vperm.xlu0 %2069, %v363_v52   ;;  %v88_v49 = vld [vmem:[%s4368_s1 + $0x268] sm:$0xff]  ;;  %v87_v50 = vld [vmem:[%s4368_s1 + $0x260] sm:$0xff] }
  0xfb   :  { %v380_v51 = vld [vmem:[%s4367_s0 + $0x468] sm:$0xff]  ;;  %v379_v52 = vld [vmem:[%s4367_s0 + $0x460] sm:$0xff] }
  0xfc   :  { %1897 = vst.msk [vmem:[%s4369_s2 + $0x1e8] sm:$0xff] %vm1835_vm0, %v1668_v55  ;;  %1896 = vst.msk [vmem:[%s4369_s2 + $0x1e0] sm:$0xff] %vm1835_vm0, %v1667_v56 }
  0xfd   :  { %v785_v61 = vpop.permute.xlu1 %784  ;;  %v780_v62 = vpop.permute.xlu0 %779 }
  0xfe   :  { %v1670_v63 = vmul.f32 %v785_v61, %v74_v57  ;;  %v1669_v0 = vmul.f32 %v780_v62, %v73_v58  ;;  %1104 = vperm.xlu1 %2070, %v366_v59   ;;  %1099 = vperm.xlu0 %2069, %v365_v60   ;;  %v90_v57 = vld [vmem:[%s4368_s1 + $0x278] sm:$0xff]  ;;  %v89_v58 = vld [vmem:[%s4368_s1 + $0x270] sm:$0xff] }
  0xff   :  { %v382_v59 = vld [vmem:[%s4367_s0 + $0x478] sm:$0xff]  ;;  %v381_v60 = vld [vmem:[%s4367_s0 + $0x470] sm:$0xff] }
 0x100   :  { %1899 = vst.msk [vmem:[%s4369_s2 + $0x1f8] sm:$0xff] %vm1835_vm0, %v1670_v63  ;;  %1898 = vst.msk [vmem:[%s4369_s2 + $0x1f0] sm:$0xff] %vm1835_vm0, %v1669_v0 }
 0x101   :  { %v795_v5 = vpop.permute.xlu1 %794  ;;  %v790_v6 = vpop.permute.xlu0 %789 }
 0x102   :  { %v1672_v7 = vmul.f32 %v795_v5, %v76_v1  ;;  %v1671_v8 = vmul.f32 %v790_v6, %v75_v2  ;;  %1114 = vperm.xlu1 %2070, %v368_v3   ;;  %1109 = vperm.xlu0 %2069, %v367_v4   ;;  %v92_v1 = vld [vmem:[%s4368_s1 + $0x288] sm:$0xff]  ;;  %v91_v2 = vld [vmem:[%s4368_s1 + $0x280] sm:$0xff] }
 0x103   :  { %v384_v3 = vld [vmem:[%s4367_s0 + $0x488] sm:$0xff]  ;;  %v383_v4 = vld [vmem:[%s4367_s0 + $0x480] sm:$0xff] }
 0x104   :  { %1901 = vst.msk [vmem:[%s4369_s2 + $0x208] sm:$0xff] %vm1835_vm0, %v1672_v7  ;;  %1900 = vst.msk [vmem:[%s4369_s2 + $0x200] sm:$0xff] %vm1835_vm0, %v1671_v8 }
 0x105   :  { %v805_v13 = vpop.permute.xlu1 %804  ;;  %v800_v14 = vpop.permute.xlu0 %799 }
 0x106   :  { %v1674_v15 = vmul.f32 %v805_v13, %v78_v9  ;;  %v1673_v16 = vmul.f32 %v800_v14, %v77_v10  ;;  %1124 = vperm.xlu1 %2070, %v370_v11   ;;  %1119 = vperm.xlu0 %2069, %v369_v12   ;;  %v94_v9 = vld [vmem:[%s4368_s1 + $0x298] sm:$0xff]  ;;  %v93_v10 = vld [vmem:[%s4368_s1 + $0x290] sm:$0xff] }
 0x107   :  { %v386_v11 = vld [vmem:[%s4367_s0 + $0x498] sm:$0xff]  ;;  %v385_v12 = vld [vmem:[%s4367_s0 + $0x490] sm:$0xff] }
 0x108   :  { %1903 = vst.msk [vmem:[%s4369_s2 + $0x218] sm:$0xff] %vm1835_vm0, %v1674_v15  ;;  %1902 = vst.msk [vmem:[%s4369_s2 + $0x210] sm:$0xff] %vm1835_vm0, %v1673_v16 }
 0x109   :  { %v815_v21 = vpop.permute.xlu1 %814  ;;  %v810_v22 = vpop.permute.xlu0 %809 }
 0x10a   :  { %v1676_v23 = vmul.f32 %v815_v21, %v80_v17  ;;  %v1675_v24 = vmul.f32 %v810_v22, %v79_v18  ;;  %1134 = vperm.xlu1 %2070, %v372_v19   ;;  %1129 = vperm.xlu0 %2069, %v371_v20   ;;  %v96_v17 = vld [vmem:[%s4368_s1 + $0x2a8] sm:$0xff]  ;;  %v95_v18 = vld [vmem:[%s4368_s1 + $0x2a0] sm:$0xff] }
 0x10b   :  { %v388_v19 = vld [vmem:[%s4367_s0 + $0x4a8] sm:$0xff]  ;;  %v387_v20 = vld [vmem:[%s4367_s0 + $0x4a0] sm:$0xff] }
 0x10c   :  { %1905 = vst.msk [vmem:[%s4369_s2 + $0x228] sm:$0xff] %vm1835_vm0, %v1676_v23  ;;  %1904 = vst.msk [vmem:[%s4369_s2 + $0x220] sm:$0xff] %vm1835_vm0, %v1675_v24 }
 0x10d   :  { %v825_v29 = vpop.permute.xlu1 %824  ;;  %v820_v30 = vpop.permute.xlu0 %819 }
 0x10e   :  { %v1678_v31 = vmul.f32 %v825_v29, %v82_v25  ;;  %v1677_v32 = vmul.f32 %v820_v30, %v81_v26  ;;  %1144 = vperm.xlu1 %2070, %v374_v27   ;;  %1139 = vperm.xlu0 %2069, %v373_v28   ;;  %v98_v25 = vld [vmem:[%s4368_s1 + $0x2b8] sm:$0xff]  ;;  %v97_v26 = vld [vmem:[%s4368_s1 + $0x2b0] sm:$0xff] }
 0x10f   :  { %v390_v27 = vld [vmem:[%s4367_s0 + $0x4b8] sm:$0xff]  ;;  %v389_v28 = vld [vmem:[%s4367_s0 + $0x4b0] sm:$0xff] }
 0x110   :  { %1907 = vst.msk [vmem:[%s4369_s2 + $0x238] sm:$0xff] %vm1835_vm0, %v1678_v31  ;;  %1906 = vst.msk [vmem:[%s4369_s2 + $0x230] sm:$0xff] %vm1835_vm0, %v1677_v32 }
 0x111   :  { %v835_v37 = vpop.permute.xlu1 %834  ;;  %v830_v38 = vpop.permute.xlu0 %829 }
 0x112   :  { %v1680_v39 = vmul.f32 %v835_v37, %v84_v33  ;;  %v1679_v40 = vmul.f32 %v830_v38, %v83_v34  ;;  %1154 = vperm.xlu1 %2070, %v376_v35   ;;  %1149 = vperm.xlu0 %2069, %v375_v36   ;;  %v100_v33 = vld [vmem:[%s4368_s1 + $0x2c8] sm:$0xff]  ;;  %v99_v34 = vld [vmem:[%s4368_s1 + $0x2c0] sm:$0xff] }
 0x113   :  { %v392_v35 = vld [vmem:[%s4367_s0 + $0x4c8] sm:$0xff]  ;;  %v391_v36 = vld [vmem:[%s4367_s0 + $0x4c0] sm:$0xff] }
 0x114   :  { %1909 = vst.msk [vmem:[%s4369_s2 + $0x248] sm:$0xff] %vm1835_vm0, %v1680_v39  ;;  %1908 = vst.msk [vmem:[%s4369_s2 + $0x240] sm:$0xff] %vm1835_vm0, %v1679_v40 }
 0x115   :  { %v845_v45 = vpop.permute.xlu1 %844  ;;  %v840_v46 = vpop.permute.xlu0 %839 }
 0x116   :  { %v1682_v47 = vmul.f32 %v845_v45, %v86_v41  ;;  %v1681_v48 = vmul.f32 %v840_v46, %v85_v42  ;;  %1164 = vperm.xlu1 %2070, %v378_v43   ;;  %1159 = vperm.xlu0 %2069, %v377_v44   ;;  %v102_v41 = vld [vmem:[%s4368_s1 + $0x2d8] sm:$0xff]  ;;  %v101_v42 = vld [vmem:[%s4368_s1 + $0x2d0] sm:$0xff] }
 0x117   :  { %v394_v43 = vld [vmem:[%s4367_s0 + $0x4d8] sm:$0xff]  ;;  %v393_v44 = vld [vmem:[%s4367_s0 + $0x4d0] sm:$0xff] }
 0x118   :  { %1911 = vst.msk [vmem:[%s4369_s2 + $0x258] sm:$0xff] %vm1835_vm0, %v1682_v47  ;;  %1910 = vst.msk [vmem:[%s4369_s2 + $0x250] sm:$0xff] %vm1835_vm0, %v1681_v48 }
 0x119   :  { %v855_v53 = vpop.permute.xlu1 %854  ;;  %v850_v54 = vpop.permute.xlu0 %849 }
 0x11a   :  { %v1684_v55 = vmul.f32 %v855_v53, %v88_v49  ;;  %v1683_v56 = vmul.f32 %v850_v54, %v87_v50  ;;  %1174 = vperm.xlu1 %2070, %v380_v51   ;;  %1169 = vperm.xlu0 %2069, %v379_v52   ;;  %v104_v49 = vld [vmem:[%s4368_s1 + $0x2e8] sm:$0xff]  ;;  %v103_v50 = vld [vmem:[%s4368_s1 + $0x2e0] sm:$0xff] }
 0x11b   :  { %v396_v51 = vld [vmem:[%s4367_s0 + $0x4e8] sm:$0xff]  ;;  %v395_v52 = vld [vmem:[%s4367_s0 + $0x4e0] sm:$0xff] }
 0x11c   :  { %1913 = vst.msk [vmem:[%s4369_s2 + $0x268] sm:$0xff] %vm1835_vm0, %v1684_v55  ;;  %1912 = vst.msk [vmem:[%s4369_s2 + $0x260] sm:$0xff] %vm1835_vm0, %v1683_v56 }
 0x11d   :  { %v865_v61 = vpop.permute.xlu1 %864  ;;  %v860_v62 = vpop.permute.xlu0 %859 }
 0x11e   :  { %v1686_v63 = vmul.f32 %v865_v61, %v90_v57  ;;  %v1685_v0 = vmul.f32 %v860_v62, %v89_v58  ;;  %1184 = vperm.xlu1 %2070, %v382_v59   ;;  %1179 = vperm.xlu0 %2069, %v381_v60   ;;  %v106_v57 = vld [vmem:[%s4368_s1 + $0x2f8] sm:$0xff]  ;;  %v105_v58 = vld [vmem:[%s4368_s1 + $0x2f0] sm:$0xff] }
 0x11f   :  { %v398_v59 = vld [vmem:[%s4367_s0 + $0x4f8] sm:$0xff]  ;;  %v397_v60 = vld [vmem:[%s4367_s0 + $0x4f0] sm:$0xff] }
 0x120   :  { %1915 = vst.msk [vmem:[%s4369_s2 + $0x278] sm:$0xff] %vm1835_vm0, %v1686_v63  ;;  %1914 = vst.msk [vmem:[%s4369_s2 + $0x270] sm:$0xff] %vm1835_vm0, %v1685_v0 }
 0x121   :  { %v875_v5 = vpop.permute.xlu1 %874  ;;  %v870_v6 = vpop.permute.xlu0 %869 }
 0x122   :  { %v1688_v7 = vmul.f32 %v875_v5, %v92_v1  ;;  %v1687_v8 = vmul.f32 %v870_v6, %v91_v2  ;;  %1194 = vperm.xlu1 %2070, %v384_v3   ;;  %1189 = vperm.xlu0 %2069, %v383_v4   ;;  %v108_v1 = vld [vmem:[%s4368_s1 + $0x308] sm:$0xff]  ;;  %v107_v2 = vld [vmem:[%s4368_s1 + $0x300] sm:$0xff] }
 0x123   :  { %v400_v3 = vld [vmem:[%s4367_s0 + $0x508] sm:$0xff]  ;;  %v399_v4 = vld [vmem:[%s4367_s0 + $0x500] sm:$0xff] }
 0x124   :  { %1917 = vst.msk [vmem:[%s4369_s2 + $0x288] sm:$0xff] %vm1835_vm0, %v1688_v7  ;;  %1916 = vst.msk [vmem:[%s4369_s2 + $0x280] sm:$0xff] %vm1835_vm0, %v1687_v8 }
 0x125   :  { %v885_v13 = vpop.permute.xlu1 %884  ;;  %v880_v14 = vpop.permute.xlu0 %879 }
 0x126   :  { %v1690_v15 = vmul.f32 %v885_v13, %v94_v9  ;;  %v1689_v16 = vmul.f32 %v880_v14, %v93_v10  ;;  %1204 = vperm.xlu1 %2070, %v386_v11   ;;  %1199 = vperm.xlu0 %2069, %v385_v12   ;;  %v110_v9 = vld [vmem:[%s4368_s1 + $0x318] sm:$0xff]  ;;  %v109_v10 = vld [vmem:[%s4368_s1 + $0x310] sm:$0xff] }
 0x127   :  { %v402_v11 = vld [vmem:[%s4367_s0 + $0x518] sm:$0xff]  ;;  %v401_v12 = vld [vmem:[%s4367_s0 + $0x510] sm:$0xff] }
 0x128   :  { %1919 = vst.msk [vmem:[%s4369_s2 + $0x298] sm:$0xff] %vm1835_vm0, %v1690_v15  ;;  %1918 = vst.msk [vmem:[%s4369_s2 + $0x290] sm:$0xff] %vm1835_vm0, %v1689_v16 }
 0x129   :  { %v895_v21 = vpop.permute.xlu1 %894  ;;  %v890_v22 = vpop.permute.xlu0 %889 }
 0x12a   :  { %v1692_v23 = vmul.f32 %v895_v21, %v96_v17  ;;  %v1691_v24 = vmul.f32 %v890_v22, %v95_v18  ;;  %1214 = vperm.xlu1 %2070, %v388_v19   ;;  %1209 = vperm.xlu0 %2069, %v387_v20   ;;  %v112_v17 = vld [vmem:[%s4368_s1 + $0x328] sm:$0xff]  ;;  %v111_v18 = vld [vmem:[%s4368_s1 + $0x320] sm:$0xff] }
 0x12b   :  { %v404_v19 = vld [vmem:[%s4367_s0 + $0x528] sm:$0xff]  ;;  %v403_v20 = vld [vmem:[%s4367_s0 + $0x520] sm:$0xff] }
 0x12c   :  { %1921 = vst.msk [vmem:[%s4369_s2 + $0x2a8] sm:$0xff] %vm1835_vm0, %v1692_v23  ;;  %1920 = vst.msk [vmem:[%s4369_s2 + $0x2a0] sm:$0xff] %vm1835_vm0, %v1691_v24 }
 0x12d   :  { %v905_v29 = vpop.permute.xlu1 %904  ;;  %v900_v30 = vpop.permute.xlu0 %899 }
 0x12e   :  { %v1694_v31 = vmul.f32 %v905_v29, %v98_v25  ;;  %v1693_v32 = vmul.f32 %v900_v30, %v97_v26  ;;  %1224 = vperm.xlu1 %2070, %v390_v27   ;;  %1219 = vperm.xlu0 %2069, %v389_v28   ;;  %v114_v25 = vld [vmem:[%s4368_s1 + $0x338] sm:$0xff]  ;;  %v113_v26 = vld [vmem:[%s4368_s1 + $0x330] sm:$0xff] }
 0x12f   :  { %v406_v27 = vld [vmem:[%s4367_s0 + $0x538] sm:$0xff]  ;;  %v405_v28 = vld [vmem:[%s4367_s0 + $0x530] sm:$0xff] }
 0x130   :  { %1923 = vst.msk [vmem:[%s4369_s2 + $0x2b8] sm:$0xff] %vm1835_vm0, %v1694_v31  ;;  %1922 = vst.msk [vmem:[%s4369_s2 + $0x2b0] sm:$0xff] %vm1835_vm0, %v1693_v32 }
 0x131   :  { %v915_v37 = vpop.permute.xlu1 %914  ;;  %v910_v38 = vpop.permute.xlu0 %909 }
 0x132   :  { %v1696_v39 = vmul.f32 %v915_v37, %v100_v33  ;;  %v1695_v40 = vmul.f32 %v910_v38, %v99_v34  ;;  %1234 = vperm.xlu1 %2070, %v392_v35   ;;  %1229 = vperm.xlu0 %2069, %v391_v36   ;;  %v116_v33 = vld [vmem:[%s4368_s1 + $0x348] sm:$0xff]  ;;  %v115_v34 = vld [vmem:[%s4368_s1 + $0x340] sm:$0xff] }
 0x133   :  { %v408_v35 = vld [vmem:[%s4367_s0 + $0x548] sm:$0xff]  ;;  %v407_v36 = vld [vmem:[%s4367_s0 + $0x540] sm:$0xff] }
 0x134   :  { %1925 = vst.msk [vmem:[%s4369_s2 + $0x2c8] sm:$0xff] %vm1835_vm0, %v1696_v39  ;;  %1924 = vst.msk [vmem:[%s4369_s2 + $0x2c0] sm:$0xff] %vm1835_vm0, %v1695_v40 }
 0x135   :  { %v925_v45 = vpop.permute.xlu1 %924  ;;  %v920_v46 = vpop.permute.xlu0 %919 }
 0x136   :  { %v1698_v47 = vmul.f32 %v925_v45, %v102_v41  ;;  %v1697_v48 = vmul.f32 %v920_v46, %v101_v42  ;;  %1244 = vperm.xlu1 %2070, %v394_v43   ;;  %1239 = vperm.xlu0 %2069, %v393_v44   ;;  %v118_v41 = vld [vmem:[%s4368_s1 + $0x358] sm:$0xff]  ;;  %v117_v42 = vld [vmem:[%s4368_s1 + $0x350] sm:$0xff] }
 0x137   :  { %v410_v43 = vld [vmem:[%s4367_s0 + $0x558] sm:$0xff]  ;;  %v409_v44 = vld [vmem:[%s4367_s0 + $0x550] sm:$0xff] }
 0x138   :  { %1927 = vst.msk [vmem:[%s4369_s2 + $0x2d8] sm:$0xff] %vm1835_vm0, %v1698_v47  ;;  %1926 = vst.msk [vmem:[%s4369_s2 + $0x2d0] sm:$0xff] %vm1835_vm0, %v1697_v48 }
 0x139   :  { %v935_v53 = vpop.permute.xlu1 %934  ;;  %v930_v54 = vpop.permute.xlu0 %929 }
 0x13a   :  { %v1700_v55 = vmul.f32 %v935_v53, %v104_v49  ;;  %v1699_v56 = vmul.f32 %v930_v54, %v103_v50  ;;  %1254 = vperm.xlu1 %2070, %v396_v51   ;;  %1249 = vperm.xlu0 %2069, %v395_v52   ;;  %v120_v49 = vld [vmem:[%s4368_s1 + $0x368] sm:$0xff]  ;;  %v119_v50 = vld [vmem:[%s4368_s1 + $0x360] sm:$0xff] }
 0x13b   :  { %v412_v51 = vld [vmem:[%s4367_s0 + $0x568] sm:$0xff]  ;;  %v411_v52 = vld [vmem:[%s4367_s0 + $0x560] sm:$0xff] }
 0x13c   :  { %1929 = vst.msk [vmem:[%s4369_s2 + $0x2e8] sm:$0xff] %vm1835_vm0, %v1700_v55  ;;  %1928 = vst.msk [vmem:[%s4369_s2 + $0x2e0] sm:$0xff] %vm1835_vm0, %v1699_v56 }
 0x13d   :  { %v945_v61 = vpop.permute.xlu1 %944  ;;  %v940_v62 = vpop.permute.xlu0 %939 }
 0x13e   :  { %v1702_v63 = vmul.f32 %v945_v61, %v106_v57  ;;  %v1701_v0 = vmul.f32 %v940_v62, %v105_v58  ;;  %1264 = vperm.xlu1 %2070, %v398_v59   ;;  %1259 = vperm.xlu0 %2069, %v397_v60   ;;  %v122_v57 = vld [vmem:[%s4368_s1 + $0x378] sm:$0xff]  ;;  %v121_v58 = vld [vmem:[%s4368_s1 + $0x370] sm:$0xff] }
 0x13f   :  { %v414_v59 = vld [vmem:[%s4367_s0 + $0x578] sm:$0xff]  ;;  %v413_v60 = vld [vmem:[%s4367_s0 + $0x570] sm:$0xff] }
 0x140   :  { %1931 = vst.msk [vmem:[%s4369_s2 + $0x2f8] sm:$0xff] %vm1835_vm0, %v1702_v63  ;;  %1930 = vst.msk [vmem:[%s4369_s2 + $0x2f0] sm:$0xff] %vm1835_vm0, %v1701_v0 }
 0x141   :  { %v955_v5 = vpop.permute.xlu1 %954  ;;  %v950_v6 = vpop.permute.xlu0 %949 }
 0x142   :  { %v1704_v7 = vmul.f32 %v955_v5, %v108_v1  ;;  %v1703_v8 = vmul.f32 %v950_v6, %v107_v2  ;;  %1274 = vperm.xlu1 %2070, %v400_v3   ;;  %1269 = vperm.xlu0 %2069, %v399_v4   ;;  %v124_v1 = vld [vmem:[%s4368_s1 + $0x388] sm:$0xff]  ;;  %v123_v2 = vld [vmem:[%s4368_s1 + $0x380] sm:$0xff] }
 0x143   :  { %v416_v3 = vld [vmem:[%s4367_s0 + $0x588] sm:$0xff]  ;;  %v415_v4 = vld [vmem:[%s4367_s0 + $0x580] sm:$0xff] }
 0x144   :  { %1933 = vst.msk [vmem:[%s4369_s2 + $0x308] sm:$0xff] %vm1835_vm0, %v1704_v7  ;;  %1932 = vst.msk [vmem:[%s4369_s2 + $0x300] sm:$0xff] %vm1835_vm0, %v1703_v8 }
 0x145   :  { %v965_v13 = vpop.permute.xlu1 %964  ;;  %v960_v14 = vpop.permute.xlu0 %959 }
 0x146   :  { %v1706_v15 = vmul.f32 %v965_v13, %v110_v9  ;;  %v1705_v16 = vmul.f32 %v960_v14, %v109_v10  ;;  %1284 = vperm.xlu1 %2070, %v402_v11   ;;  %1279 = vperm.xlu0 %2069, %v401_v12   ;;  %v126_v9 = vld [vmem:[%s4368_s1 + $0x398] sm:$0xff]  ;;  %v125_v10 = vld [vmem:[%s4368_s1 + $0x390] sm:$0xff] }
 0x147   :  { %v418_v11 = vld [vmem:[%s4367_s0 + $0x598] sm:$0xff]  ;;  %v417_v12 = vld [vmem:[%s4367_s0 + $0x590] sm:$0xff] }
 0x148   :  { %1935 = vst.msk [vmem:[%s4369_s2 + $0x318] sm:$0xff] %vm1835_vm0, %v1706_v15  ;;  %1934 = vst.msk [vmem:[%s4369_s2 + $0x310] sm:$0xff] %vm1835_vm0, %v1705_v16 }
 0x149   :  { %v975_v21 = vpop.permute.xlu1 %974  ;;  %v970_v22 = vpop.permute.xlu0 %969 }
 0x14a   :  { %v1708_v23 = vmul.f32 %v975_v21, %v112_v17  ;;  %v1707_v24 = vmul.f32 %v970_v22, %v111_v18  ;;  %1294 = vperm.xlu1 %2070, %v404_v19   ;;  %1289 = vperm.xlu0 %2069, %v403_v20   ;;  %v128_v17 = vld [vmem:[%s4368_s1 + $0x3a8] sm:$0xff]  ;;  %v127_v18 = vld [vmem:[%s4368_s1 + $0x3a0] sm:$0xff] }
 0x14b   :  { %v420_v19 = vld [vmem:[%s4367_s0 + $0x5a8] sm:$0xff]  ;;  %v419_v20 = vld [vmem:[%s4367_s0 + $0x5a0] sm:$0xff] }
 0x14c   :  { %1937 = vst.msk [vmem:[%s4369_s2 + $0x328] sm:$0xff] %vm1835_vm0, %v1708_v23  ;;  %1936 = vst.msk [vmem:[%s4369_s2 + $0x320] sm:$0xff] %vm1835_vm0, %v1707_v24 }
 0x14d   :  { %v985_v29 = vpop.permute.xlu1 %984  ;;  %v980_v30 = vpop.permute.xlu0 %979 }
 0x14e   :  { %v1710_v31 = vmul.f32 %v985_v29, %v114_v25  ;;  %v1709_v32 = vmul.f32 %v980_v30, %v113_v26  ;;  %1304 = vperm.xlu1 %2070, %v406_v27   ;;  %1299 = vperm.xlu0 %2069, %v405_v28   ;;  %v130_v25 = vld [vmem:[%s4368_s1 + $0x3b8] sm:$0xff]  ;;  %v129_v26 = vld [vmem:[%s4368_s1 + $0x3b0] sm:$0xff] }
 0x14f   :  { %v422_v27 = vld [vmem:[%s4367_s0 + $0x5b8] sm:$0xff]  ;;  %v421_v28 = vld [vmem:[%s4367_s0 + $0x5b0] sm:$0xff] }
 0x150   :  { %1939 = vst.msk [vmem:[%s4369_s2 + $0x338] sm:$0xff] %vm1835_vm0, %v1710_v31  ;;  %1938 = vst.msk [vmem:[%s4369_s2 + $0x330] sm:$0xff] %vm1835_vm0, %v1709_v32 }
 0x151   :  { %v995_v37 = vpop.permute.xlu1 %994  ;;  %v990_v38 = vpop.permute.xlu0 %989 }
 0x152   :  { %v1712_v39 = vmul.f32 %v995_v37, %v116_v33  ;;  %v1711_v40 = vmul.f32 %v990_v38, %v115_v34  ;;  %1314 = vperm.xlu1 %2070, %v408_v35   ;;  %1309 = vperm.xlu0 %2069, %v407_v36   ;;  %v132_v33 = vld [vmem:[%s4368_s1 + $0x3c8] sm:$0xff]  ;;  %v131_v34 = vld [vmem:[%s4368_s1 + $0x3c0] sm:$0xff] }
 0x153   :  { %v424_v35 = vld [vmem:[%s4367_s0 + $0x5c8] sm:$0xff]  ;;  %v423_v36 = vld [vmem:[%s4367_s0 + $0x5c0] sm:$0xff] }
 0x154   :  { %1941 = vst.msk [vmem:[%s4369_s2 + $0x348] sm:$0xff] %vm1835_vm0, %v1712_v39  ;;  %1940 = vst.msk [vmem:[%s4369_s2 + $0x340] sm:$0xff] %vm1835_vm0, %v1711_v40 }
 0x155   :  { %v1005_v45 = vpop.permute.xlu1 %1004  ;;  %v1000_v46 = vpop.permute.xlu0 %999 }
 0x156   :  { %v1714_v47 = vmul.f32 %v1005_v45, %v118_v41  ;;  %v1713_v48 = vmul.f32 %v1000_v46, %v117_v42  ;;  %1324 = vperm.xlu1 %2070, %v410_v43   ;;  %1319 = vperm.xlu0 %2069, %v409_v44   ;;  %v134_v41 = vld [vmem:[%s4368_s1 + $0x3d8] sm:$0xff]  ;;  %v133_v42 = vld [vmem:[%s4368_s1 + $0x3d0] sm:$0xff] }
 0x157   :  { %v426_v43 = vld [vmem:[%s4367_s0 + $0x5d8] sm:$0xff]  ;;  %v425_v44 = vld [vmem:[%s4367_s0 + $0x5d0] sm:$0xff] }
 0x158   :  { %1943 = vst.msk [vmem:[%s4369_s2 + $0x358] sm:$0xff] %vm1835_vm0, %v1714_v47  ;;  %1942 = vst.msk [vmem:[%s4369_s2 + $0x350] sm:$0xff] %vm1835_vm0, %v1713_v48 }
 0x159   :  { %v1015_v53 = vpop.permute.xlu1 %1014  ;;  %v1010_v54 = vpop.permute.xlu0 %1009 }
 0x15a   :  { %v1716_v55 = vmul.f32 %v1015_v53, %v120_v49  ;;  %v1715_v56 = vmul.f32 %v1010_v54, %v119_v50  ;;  %1334 = vperm.xlu1 %2070, %v412_v51   ;;  %1329 = vperm.xlu0 %2069, %v411_v52   ;;  %v136_v49 = vld [vmem:[%s4368_s1 + $0x3e8] sm:$0xff]  ;;  %v135_v50 = vld [vmem:[%s4368_s1 + $0x3e0] sm:$0xff] }
 0x15b   :  { %v428_v51 = vld [vmem:[%s4367_s0 + $0x5e8] sm:$0xff]  ;;  %v427_v52 = vld [vmem:[%s4367_s0 + $0x5e0] sm:$0xff] }
 0x15c   :  { %1945 = vst.msk [vmem:[%s4369_s2 + $0x368] sm:$0xff] %vm1835_vm0, %v1716_v55  ;;  %1944 = vst.msk [vmem:[%s4369_s2 + $0x360] sm:$0xff] %vm1835_vm0, %v1715_v56 }
 0x15d   :  { %v1025_v61 = vpop.permute.xlu1 %1024  ;;  %v1020_v62 = vpop.permute.xlu0 %1019 }
 0x15e   :  { %v1718_v63 = vmul.f32 %v1025_v61, %v122_v57  ;;  %v1717_v0 = vmul.f32 %v1020_v62, %v121_v58  ;;  %1344 = vperm.xlu1 %2070, %v414_v59   ;;  %1339 = vperm.xlu0 %2069, %v413_v60   ;;  %v138_v57 = vld [vmem:[%s4368_s1 + $0x3f8] sm:$0xff]  ;;  %v137_v58 = vld [vmem:[%s4368_s1 + $0x3f0] sm:$0xff] }
 0x15f   :  { %v430_v59 = vld [vmem:[%s4367_s0 + $0x5f8] sm:$0xff]  ;;  %v429_v60 = vld [vmem:[%s4367_s0 + $0x5f0] sm:$0xff] }
 0x160   :  { %1947 = vst.msk [vmem:[%s4369_s2 + $0x378] sm:$0xff] %vm1835_vm0, %v1718_v63  ;;  %1946 = vst.msk [vmem:[%s4369_s2 + $0x370] sm:$0xff] %vm1835_vm0, %v1717_v0 }
 0x161   :  { %v1035_v5 = vpop.permute.xlu1 %1034  ;;  %v1030_v6 = vpop.permute.xlu0 %1029 }
 0x162   :  { %v1720_v7 = vmul.f32 %v1035_v5, %v124_v1  ;;  %v1719_v8 = vmul.f32 %v1030_v6, %v123_v2  ;;  %1354 = vperm.xlu1 %2070, %v416_v3   ;;  %1349 = vperm.xlu0 %2069, %v415_v4   ;;  %v140_v1 = vld [vmem:[%s4368_s1 + $0x408] sm:$0xff]  ;;  %v139_v2 = vld [vmem:[%s4368_s1 + $0x400] sm:$0xff] }
 0x163   :  { %v432_v3 = vld [vmem:[%s4367_s0 + $0x608] sm:$0xff]  ;;  %v431_v4 = vld [vmem:[%s4367_s0 + $0x600] sm:$0xff] }
 0x164   :  { %1949 = vst.msk [vmem:[%s4369_s2 + $0x388] sm:$0xff] %vm1835_vm0, %v1720_v7  ;;  %1948 = vst.msk [vmem:[%s4369_s2 + $0x380] sm:$0xff] %vm1835_vm0, %v1719_v8 }
 0x165   :  { %v1045_v13 = vpop.permute.xlu1 %1044  ;;  %v1040_v14 = vpop.permute.xlu0 %1039 }
 0x166   :  { %v1722_v15 = vmul.f32 %v1045_v13, %v126_v9  ;;  %v1721_v16 = vmul.f32 %v1040_v14, %v125_v10  ;;  %1364 = vperm.xlu1 %2070, %v418_v11   ;;  %1359 = vperm.xlu0 %2069, %v417_v12   ;;  %v142_v9 = vld [vmem:[%s4368_s1 + $0x418] sm:$0xff]  ;;  %v141_v10 = vld [vmem:[%s4368_s1 + $0x410] sm:$0xff] }
 0x167   :  { %v434_v11 = vld [vmem:[%s4367_s0 + $0x618] sm:$0xff]  ;;  %v433_v12 = vld [vmem:[%s4367_s0 + $0x610] sm:$0xff] }
 0x168   :  { %1951 = vst.msk [vmem:[%s4369_s2 + $0x398] sm:$0xff] %vm1835_vm0, %v1722_v15  ;;  %1950 = vst.msk [vmem:[%s4369_s2 + $0x390] sm:$0xff] %vm1835_vm0, %v1721_v16 }
 0x169   :  { %v1055_v21 = vpop.permute.xlu1 %1054  ;;  %v1050_v22 = vpop.permute.xlu0 %1049 }
 0x16a   :  { %v1724_v23 = vmul.f32 %v1055_v21, %v128_v17  ;;  %v1723_v24 = vmul.f32 %v1050_v22, %v127_v18  ;;  %1374 = vperm.xlu1 %2070, %v420_v19   ;;  %1369 = vperm.xlu0 %2069, %v419_v20   ;;  %v144_v17 = vld [vmem:[%s4368_s1 + $0x428] sm:$0xff]  ;;  %v143_v18 = vld [vmem:[%s4368_s1 + $0x420] sm:$0xff] }
 0x16b   :  { %v436_v19 = vld [vmem:[%s4367_s0 + $0x628] sm:$0xff]  ;;  %v435_v20 = vld [vmem:[%s4367_s0 + $0x620] sm:$0xff] }
 0x16c   :  { %1953 = vst.msk [vmem:[%s4369_s2 + $0x3a8] sm:$0xff] %vm1835_vm0, %v1724_v23  ;;  %1952 = vst.msk [vmem:[%s4369_s2 + $0x3a0] sm:$0xff] %vm1835_vm0, %v1723_v24 }
 0x16d   :  { %v1065_v29 = vpop.permute.xlu1 %1064  ;;  %v1060_v30 = vpop.permute.xlu0 %1059 }
 0x16e   :  { %v1726_v31 = vmul.f32 %v1065_v29, %v130_v25  ;;  %v1725_v32 = vmul.f32 %v1060_v30, %v129_v26  ;;  %1384 = vperm.xlu1 %2070, %v422_v27   ;;  %1379 = vperm.xlu0 %2069, %v421_v28   ;;  %v146_v25 = vld [vmem:[%s4368_s1 + $0x438] sm:$0xff]  ;;  %v145_v26 = vld [vmem:[%s4368_s1 + $0x430] sm:$0xff] }
 0x16f   :  { %v438_v27 = vld [vmem:[%s4367_s0 + $0x638] sm:$0xff]  ;;  %v437_v28 = vld [vmem:[%s4367_s0 + $0x630] sm:$0xff] }
 0x170   :  { %1955 = vst.msk [vmem:[%s4369_s2 + $0x3b8] sm:$0xff] %vm1835_vm0, %v1726_v31  ;;  %1954 = vst.msk [vmem:[%s4369_s2 + $0x3b0] sm:$0xff] %vm1835_vm0, %v1725_v32 }
 0x171   :  { %v1075_v37 = vpop.permute.xlu1 %1074  ;;  %v1070_v38 = vpop.permute.xlu0 %1069 }
 0x172   :  { %v1728_v39 = vmul.f32 %v1075_v37, %v132_v33  ;;  %v1727_v40 = vmul.f32 %v1070_v38, %v131_v34  ;;  %1394 = vperm.xlu1 %2070, %v424_v35   ;;  %1389 = vperm.xlu0 %2069, %v423_v36   ;;  %v148_v33 = vld [vmem:[%s4368_s1 + $0x448] sm:$0xff]  ;;  %v147_v34 = vld [vmem:[%s4368_s1 + $0x440] sm:$0xff] }
 0x173   :  { %v440_v35 = vld [vmem:[%s4367_s0 + $0x648] sm:$0xff]  ;;  %v439_v36 = vld [vmem:[%s4367_s0 + $0x640] sm:$0xff] }
 0x174   :  { %1957 = vst.msk [vmem:[%s4369_s2 + $0x3c8] sm:$0xff] %vm1835_vm0, %v1728_v39  ;;  %1956 = vst.msk [vmem:[%s4369_s2 + $0x3c0] sm:$0xff] %vm1835_vm0, %v1727_v40 }
 0x175   :  { %v1085_v45 = vpop.permute.xlu1 %1084  ;;  %v1080_v46 = vpop.permute.xlu0 %1079 }
 0x176   :  { %v1730_v47 = vmul.f32 %v1085_v45, %v134_v41  ;;  %v1729_v48 = vmul.f32 %v1080_v46, %v133_v42  ;;  %1404 = vperm.xlu1 %2070, %v426_v43   ;;  %1399 = vperm.xlu0 %2069, %v425_v44   ;;  %v150_v41 = vld [vmem:[%s4368_s1 + $0x458] sm:$0xff]  ;;  %v149_v42 = vld [vmem:[%s4368_s1 + $0x450] sm:$0xff] }
 0x177   :  { %v442_v43 = vld [vmem:[%s4367_s0 + $0x658] sm:$0xff]  ;;  %v441_v44 = vld [vmem:[%s4367_s0 + $0x650] sm:$0xff] }
 0x178   :  { %1959 = vst.msk [vmem:[%s4369_s2 + $0x3d8] sm:$0xff] %vm1835_vm0, %v1730_v47  ;;  %1958 = vst.msk [vmem:[%s4369_s2 + $0x3d0] sm:$0xff] %vm1835_vm0, %v1729_v48 }
 0x179   :  { %v1095_v53 = vpop.permute.xlu1 %1094  ;;  %v1090_v54 = vpop.permute.xlu0 %1089 }
 0x17a   :  { %v1732_v55 = vmul.f32 %v1095_v53, %v136_v49  ;;  %v1731_v56 = vmul.f32 %v1090_v54, %v135_v50  ;;  %1414 = vperm.xlu1 %2070, %v428_v51   ;;  %1409 = vperm.xlu0 %2069, %v427_v52   ;;  %v152_v49 = vld [vmem:[%s4368_s1 + $0x468] sm:$0xff]  ;;  %v151_v50 = vld [vmem:[%s4368_s1 + $0x460] sm:$0xff] }
 0x17b   :  { %v444_v51 = vld [vmem:[%s4367_s0 + $0x668] sm:$0xff]  ;;  %v443_v52 = vld [vmem:[%s4367_s0 + $0x660] sm:$0xff] }
 0x17c   :  { %1961 = vst.msk [vmem:[%s4369_s2 + $0x3e8] sm:$0xff] %vm1835_vm0, %v1732_v55  ;;  %1960 = vst.msk [vmem:[%s4369_s2 + $0x3e0] sm:$0xff] %vm1835_vm0, %v1731_v56 }
 0x17d   :  { %v1105_v61 = vpop.permute.xlu1 %1104  ;;  %v1100_v62 = vpop.permute.xlu0 %1099 }
 0x17e   :  { %v1734_v63 = vmul.f32 %v1105_v61, %v138_v57  ;;  %v1733_v0 = vmul.f32 %v1100_v62, %v137_v58  ;;  %1424 = vperm.xlu1 %2070, %v430_v59   ;;  %1419 = vperm.xlu0 %2069, %v429_v60   ;;  %v154_v57 = vld [vmem:[%s4368_s1 + $0x478] sm:$0xff]  ;;  %v153_v58 = vld [vmem:[%s4368_s1 + $0x470] sm:$0xff] }
 0x17f   :  { %v446_v59 = vld [vmem:[%s4367_s0 + $0x678] sm:$0xff]  ;;  %v445_v60 = vld [vmem:[%s4367_s0 + $0x670] sm:$0xff] }
 0x180   :  { %1963 = vst.msk [vmem:[%s4369_s2 + $0x3f8] sm:$0xff] %vm1835_vm0, %v1734_v63  ;;  %1962 = vst.msk [vmem:[%s4369_s2 + $0x3f0] sm:$0xff] %vm1835_vm0, %v1733_v0 }
 0x181   :  { %v1115_v5 = vpop.permute.xlu1 %1114  ;;  %v1110_v6 = vpop.permute.xlu0 %1109 }
 0x182   :  { %v1736_v7 = vmul.f32 %v1115_v5, %v140_v1  ;;  %v1735_v8 = vmul.f32 %v1110_v6, %v139_v2  ;;  %1434 = vperm.xlu1 %2070, %v432_v3   ;;  %1429 = vperm.xlu0 %2069, %v431_v4   ;;  %v156_v1 = vld [vmem:[%s4368_s1 + $0x488] sm:$0xff]  ;;  %v155_v2 = vld [vmem:[%s4368_s1 + $0x480] sm:$0xff] }
 0x183   :  { %v448_v3 = vld [vmem:[%s4367_s0 + $0x688] sm:$0xff]  ;;  %v447_v4 = vld [vmem:[%s4367_s0 + $0x680] sm:$0xff] }
 0x184   :  { %1965 = vst.msk [vmem:[%s4369_s2 + $0x408] sm:$0xff] %vm1835_vm0, %v1736_v7  ;;  %1964 = vst.msk [vmem:[%s4369_s2 + $0x400] sm:$0xff] %vm1835_vm0, %v1735_v8 }
 0x185   :  { %v1125_v13 = vpop.permute.xlu1 %1124  ;;  %v1120_v14 = vpop.permute.xlu0 %1119 }
 0x186   :  { %v1738_v15 = vmul.f32 %v1125_v13, %v142_v9  ;;  %v1737_v16 = vmul.f32 %v1120_v14, %v141_v10  ;;  %1444 = vperm.xlu1 %2070, %v434_v11   ;;  %1439 = vperm.xlu0 %2069, %v433_v12   ;;  %v158_v9 = vld [vmem:[%s4368_s1 + $0x498] sm:$0xff]  ;;  %v157_v10 = vld [vmem:[%s4368_s1 + $0x490] sm:$0xff] }
 0x187   :  { %v450_v11 = vld [vmem:[%s4367_s0 + $0x698] sm:$0xff]  ;;  %v449_v12 = vld [vmem:[%s4367_s0 + $0x690] sm:$0xff] }
 0x188   :  { %1967 = vst.msk [vmem:[%s4369_s2 + $0x418] sm:$0xff] %vm1835_vm0, %v1738_v15  ;;  %1966 = vst.msk [vmem:[%s4369_s2 + $0x410] sm:$0xff] %vm1835_vm0, %v1737_v16 }
 0x189   :  { %v1135_v21 = vpop.permute.xlu1 %1134  ;;  %v1130_v22 = vpop.permute.xlu0 %1129 }
 0x18a   :  { %v1740_v23 = vmul.f32 %v1135_v21, %v144_v17  ;;  %v1739_v24 = vmul.f32 %v1130_v22, %v143_v18  ;;  %1454 = vperm.xlu1 %2070, %v436_v19   ;;  %1449 = vperm.xlu0 %2069, %v435_v20   ;;  %v160_v17 = vld [vmem:[%s4368_s1 + $0x4a8] sm:$0xff]  ;;  %v159_v18 = vld [vmem:[%s4368_s1 + $0x4a0] sm:$0xff] }
 0x18b   :  { %v452_v19 = vld [vmem:[%s4367_s0 + $0x6a8] sm:$0xff]  ;;  %v451_v20 = vld [vmem:[%s4367_s0 + $0x6a0] sm:$0xff] }
 0x18c   :  { %1969 = vst.msk [vmem:[%s4369_s2 + $0x428] sm:$0xff] %vm1835_vm0, %v1740_v23  ;;  %1968 = vst.msk [vmem:[%s4369_s2 + $0x420] sm:$0xff] %vm1835_vm0, %v1739_v24 }
 0x18d   :  { %v1145_v29 = vpop.permute.xlu1 %1144  ;;  %v1140_v30 = vpop.permute.xlu0 %1139 }
 0x18e   :  { %v1742_v31 = vmul.f32 %v1145_v29, %v146_v25  ;;  %v1741_v32 = vmul.f32 %v1140_v30, %v145_v26  ;;  %1464 = vperm.xlu1 %2070, %v438_v27   ;;  %1459 = vperm.xlu0 %2069, %v437_v28   ;;  %v162_v25 = vld [vmem:[%s4368_s1 + $0x4b8] sm:$0xff]  ;;  %v161_v26 = vld [vmem:[%s4368_s1 + $0x4b0] sm:$0xff] }
 0x18f   :  { %v454_v27 = vld [vmem:[%s4367_s0 + $0x6b8] sm:$0xff]  ;;  %v453_v28 = vld [vmem:[%s4367_s0 + $0x6b0] sm:$0xff] }
 0x190   :  { %1971 = vst.msk [vmem:[%s4369_s2 + $0x438] sm:$0xff] %vm1835_vm0, %v1742_v31  ;;  %1970 = vst.msk [vmem:[%s4369_s2 + $0x430] sm:$0xff] %vm1835_vm0, %v1741_v32 }
 0x191   :  { %v1155_v37 = vpop.permute.xlu1 %1154  ;;  %v1150_v38 = vpop.permute.xlu0 %1149 }
 0x192   :  { %v1744_v39 = vmul.f32 %v1155_v37, %v148_v33  ;;  %v1743_v40 = vmul.f32 %v1150_v38, %v147_v34  ;;  %1474 = vperm.xlu1 %2070, %v440_v35   ;;  %1469 = vperm.xlu0 %2069, %v439_v36   ;;  %v164_v33 = vld [vmem:[%s4368_s1 + $0x4c8] sm:$0xff]  ;;  %v163_v34 = vld [vmem:[%s4368_s1 + $0x4c0] sm:$0xff] }
 0x193   :  { %v456_v35 = vld [vmem:[%s4367_s0 + $0x6c8] sm:$0xff]  ;;  %v455_v36 = vld [vmem:[%s4367_s0 + $0x6c0] sm:$0xff] }
 0x194   :  { %1973 = vst.msk [vmem:[%s4369_s2 + $0x448] sm:$0xff] %vm1835_vm0, %v1744_v39  ;;  %1972 = vst.msk [vmem:[%s4369_s2 + $0x440] sm:$0xff] %vm1835_vm0, %v1743_v40 }
 0x195   :  { %v1165_v45 = vpop.permute.xlu1 %1164  ;;  %v1160_v46 = vpop.permute.xlu0 %1159 }
 0x196   :  { %v1746_v47 = vmul.f32 %v1165_v45, %v150_v41  ;;  %v1745_v48 = vmul.f32 %v1160_v46, %v149_v42  ;;  %1484 = vperm.xlu1 %2070, %v442_v43   ;;  %1479 = vperm.xlu0 %2069, %v441_v44   ;;  %v166_v41 = vld [vmem:[%s4368_s1 + $0x4d8] sm:$0xff]  ;;  %v165_v42 = vld [vmem:[%s4368_s1 + $0x4d0] sm:$0xff] }
 0x197   :  { %v458_v43 = vld [vmem:[%s4367_s0 + $0x6d8] sm:$0xff]  ;;  %v457_v44 = vld [vmem:[%s4367_s0 + $0x6d0] sm:$0xff] }
 0x198   :  { %1975 = vst.msk [vmem:[%s4369_s2 + $0x458] sm:$0xff] %vm1835_vm0, %v1746_v47  ;;  %1974 = vst.msk [vmem:[%s4369_s2 + $0x450] sm:$0xff] %vm1835_vm0, %v1745_v48 }
 0x199   :  { %v1175_v53 = vpop.permute.xlu1 %1174  ;;  %v1170_v54 = vpop.permute.xlu0 %1169 }
 0x19a   :  { %v1748_v55 = vmul.f32 %v1175_v53, %v152_v49  ;;  %v1747_v56 = vmul.f32 %v1170_v54, %v151_v50  ;;  %1494 = vperm.xlu1 %2070, %v444_v51   ;;  %1489 = vperm.xlu0 %2069, %v443_v52   ;;  %v168_v49 = vld [vmem:[%s4368_s1 + $0x4e8] sm:$0xff]  ;;  %v167_v50 = vld [vmem:[%s4368_s1 + $0x4e0] sm:$0xff] }
 0x19b   :  { %v460_v51 = vld [vmem:[%s4367_s0 + $0x6e8] sm:$0xff]  ;;  %v459_v52 = vld [vmem:[%s4367_s0 + $0x6e0] sm:$0xff] }
 0x19c   :  { %1977 = vst.msk [vmem:[%s4369_s2 + $0x468] sm:$0xff] %vm1835_vm0, %v1748_v55  ;;  %1976 = vst.msk [vmem:[%s4369_s2 + $0x460] sm:$0xff] %vm1835_vm0, %v1747_v56 }
 0x19d   :  { %v1185_v61 = vpop.permute.xlu1 %1184  ;;  %v1180_v62 = vpop.permute.xlu0 %1179 }
 0x19e   :  { %v1750_v63 = vmul.f32 %v1185_v61, %v154_v57  ;;  %v1749_v0 = vmul.f32 %v1180_v62, %v153_v58  ;;  %1504 = vperm.xlu1 %2070, %v446_v59   ;;  %1499 = vperm.xlu0 %2069, %v445_v60   ;;  %v170_v57 = vld [vmem:[%s4368_s1 + $0x4f8] sm:$0xff]  ;;  %v169_v58 = vld [vmem:[%s4368_s1 + $0x4f0] sm:$0xff] }
 0x19f   :  { %v462_v59 = vld [vmem:[%s4367_s0 + $0x6f8] sm:$0xff]  ;;  %v461_v60 = vld [vmem:[%s4367_s0 + $0x6f0] sm:$0xff] }
 0x1a0   :  { %1979 = vst.msk [vmem:[%s4369_s2 + $0x478] sm:$0xff] %vm1835_vm0, %v1750_v63  ;;  %1978 = vst.msk [vmem:[%s4369_s2 + $0x470] sm:$0xff] %vm1835_vm0, %v1749_v0 }
 0x1a1   :  { %v1195_v5 = vpop.permute.xlu1 %1194  ;;  %v1190_v6 = vpop.permute.xlu0 %1189 }
 0x1a2   :  { %v1752_v7 = vmul.f32 %v1195_v5, %v156_v1  ;;  %v1751_v8 = vmul.f32 %v1190_v6, %v155_v2  ;;  %1514 = vperm.xlu1 %2070, %v448_v3   ;;  %1509 = vperm.xlu0 %2069, %v447_v4   ;;  %v172_v1 = vld [vmem:[%s4368_s1 + $0x508] sm:$0xff]  ;;  %v171_v2 = vld [vmem:[%s4368_s1 + $0x500] sm:$0xff] }
 0x1a3   :  { %v464_v3 = vld [vmem:[%s4367_s0 + $0x708] sm:$0xff]  ;;  %v463_v4 = vld [vmem:[%s4367_s0 + $0x700] sm:$0xff] }
 0x1a4   :  { %1981 = vst.msk [vmem:[%s4369_s2 + $0x488] sm:$0xff] %vm1835_vm0, %v1752_v7  ;;  %1980 = vst.msk [vmem:[%s4369_s2 + $0x480] sm:$0xff] %vm1835_vm0, %v1751_v8 }
 0x1a5   :  { %v1205_v13 = vpop.permute.xlu1 %1204  ;;  %v1200_v14 = vpop.permute.xlu0 %1199 }
 0x1a6   :  { %v1754_v15 = vmul.f32 %v1205_v13, %v158_v9  ;;  %v1753_v16 = vmul.f32 %v1200_v14, %v157_v10  ;;  %1524 = vperm.xlu1 %2070, %v450_v11   ;;  %1519 = vperm.xlu0 %2069, %v449_v12   ;;  %v174_v9 = vld [vmem:[%s4368_s1 + $0x518] sm:$0xff]  ;;  %v173_v10 = vld [vmem:[%s4368_s1 + $0x510] sm:$0xff] }
 0x1a7   :  { %v466_v11 = vld [vmem:[%s4367_s0 + $0x718] sm:$0xff]  ;;  %v465_v12 = vld [vmem:[%s4367_s0 + $0x710] sm:$0xff] }
 0x1a8   :  { %1983 = vst.msk [vmem:[%s4369_s2 + $0x498] sm:$0xff] %vm1835_vm0, %v1754_v15  ;;  %1982 = vst.msk [vmem:[%s4369_s2 + $0x490] sm:$0xff] %vm1835_vm0, %v1753_v16 }
 0x1a9   :  { %v1215_v21 = vpop.permute.xlu1 %1214  ;;  %v1210_v22 = vpop.permute.xlu0 %1209 }
 0x1aa   :  { %v1756_v23 = vmul.f32 %v1215_v21, %v160_v17  ;;  %v1755_v24 = vmul.f32 %v1210_v22, %v159_v18  ;;  %1534 = vperm.xlu1 %2070, %v452_v19   ;;  %1529 = vperm.xlu0 %2069, %v451_v20   ;;  %v176_v17 = vld [vmem:[%s4368_s1 + $0x528] sm:$0xff]  ;;  %v175_v18 = vld [vmem:[%s4368_s1 + $0x520] sm:$0xff] }
 0x1ac   :  { %1985 = vst.msk [vmem:[%s4369_s2 + $0x4a8] sm:$0xff] %vm1835_vm0, %v1756_v23  ;;  %1984 = vst.msk [vmem:[%s4369_s2 + $0x4a0] sm:$0xff] %vm1835_vm0, %v1755_v24  ;;  %v178_v23 = vld [vmem:[%s4368_s1 + $0x538] sm:$0xff]  ;;  %v177_v24 = vld [vmem:[%s4368_s1 + $0x530] sm:$0xff] }
 0x1ad   :  { %v1225_v29 = vpop.permute.xlu1 %1224  ;;  %v1220_v30 = vpop.permute.xlu0 %1219 }
 0x1ae   :  { %v1758_v31 = vmul.f32 %v1225_v29, %v162_v25  ;;  %v1757_v32 = vmul.f32 %v1220_v30, %v161_v26  ;;  %1544 = vperm.xlu1 %2070, %v454_v27   ;;  %1539 = vperm.xlu0 %2069, %v453_v28   ;;  %v180_v29 = vld [vmem:[%s4368_s1 + $0x548] sm:$0xff]  ;;  %v179_v30 = vld [vmem:[%s4368_s1 + $0x540] sm:$0xff] }
 0x1b0   :  { %1987 = vst.msk [vmem:[%s4369_s2 + $0x4b8] sm:$0xff] %vm1835_vm0, %v1758_v31  ;;  %1986 = vst.msk [vmem:[%s4369_s2 + $0x4b0] sm:$0xff] %vm1835_vm0, %v1757_v32 }
 0x1b1   :  { %v1235_v37 = vpop.permute.xlu1 %1234  ;;  %v1230_v38 = vpop.permute.xlu0 %1229 }
 0x1b2   :  { %v1760_v39 = vmul.f32 %v1235_v37, %v164_v33  ;;  %v1759_v40 = vmul.f32 %v1230_v38, %v163_v34  ;;  %1554 = vperm.xlu1 %2070, %v456_v35   ;;  %1549 = vperm.xlu0 %2069, %v455_v36   ;;  %v182_v35 = vld [vmem:[%s4368_s1 + $0x558] sm:$0xff]  ;;  %v181_v36 = vld [vmem:[%s4368_s1 + $0x550] sm:$0xff] }
 0x1b4   :  { %1989 = vst.msk [vmem:[%s4369_s2 + $0x4c8] sm:$0xff] %vm1835_vm0, %v1760_v39  ;;  %1988 = vst.msk [vmem:[%s4369_s2 + $0x4c0] sm:$0xff] %vm1835_vm0, %v1759_v40 }
 0x1b5   :  { %v1245_v45 = vpop.permute.xlu1 %1244  ;;  %v1240_v46 = vpop.permute.xlu0 %1239 }
 0x1b6   :  { %v1762_v47 = vmul.f32 %v1245_v45, %v166_v41  ;;  %v1761_v48 = vmul.f32 %v1240_v46, %v165_v42  ;;  %1564 = vperm.xlu1 %2070, %v458_v43   ;;  %1559 = vperm.xlu0 %2069, %v457_v44   ;;  %v184_v41 = vld [vmem:[%s4368_s1 + $0x568] sm:$0xff]  ;;  %v183_v42 = vld [vmem:[%s4368_s1 + $0x560] sm:$0xff] }
 0x1b8   :  { %1991 = vst.msk [vmem:[%s4369_s2 + $0x4d8] sm:$0xff] %vm1835_vm0, %v1762_v47  ;;  %1990 = vst.msk [vmem:[%s4369_s2 + $0x4d0] sm:$0xff] %vm1835_vm0, %v1761_v48  ;;  %v186_v47 = vld [vmem:[%s4368_s1 + $0x578] sm:$0xff]  ;;  %v185_v48 = vld [vmem:[%s4368_s1 + $0x570] sm:$0xff] }
 0x1b9   :  { %v1255_v53 = vpop.permute.xlu1 %1254  ;;  %v1250_v54 = vpop.permute.xlu0 %1249 }
 0x1ba   :  { %v1764_v55 = vmul.f32 %v1255_v53, %v168_v49  ;;  %v1763_v56 = vmul.f32 %v1250_v54, %v167_v50  ;;  %1574 = vperm.xlu1 %2070, %v460_v51   ;;  %1569 = vperm.xlu0 %2069, %v459_v52   ;;  %v188_v53 = vld [vmem:[%s4368_s1 + $0x588] sm:$0xff]  ;;  %v187_v54 = vld [vmem:[%s4368_s1 + $0x580] sm:$0xff] }
 0x1bc   :  { %1993 = vst.msk [vmem:[%s4369_s2 + $0x4e8] sm:$0xff] %vm1835_vm0, %v1764_v55  ;;  %1992 = vst.msk [vmem:[%s4369_s2 + $0x4e0] sm:$0xff] %vm1835_vm0, %v1763_v56 }
 0x1bd   :  { %v1265_v61 = vpop.permute.xlu1 %1264  ;;  %v1260_v62 = vpop.permute.xlu0 %1259 }
 0x1be   :  { %v1766_v63 = vmul.f32 %v1265_v61, %v170_v57  ;;  %v1765_v0 = vmul.f32 %v1260_v62, %v169_v58  ;;  %1584 = vperm.xlu1 %2070, %v462_v59   ;;  %1579 = vperm.xlu0 %2069, %v461_v60   ;;  %v190_v59 = vld [vmem:[%s4368_s1 + $0x598] sm:$0xff]  ;;  %v189_v60 = vld [vmem:[%s4368_s1 + $0x590] sm:$0xff] }
 0x1c0   :  { %1995 = vst.msk [vmem:[%s4369_s2 + $0x4f8] sm:$0xff] %vm1835_vm0, %v1766_v63  ;;  %1994 = vst.msk [vmem:[%s4369_s2 + $0x4f0] sm:$0xff] %vm1835_vm0, %v1765_v0 }
 0x1c1   :  { %v1275_v5 = vpop.permute.xlu1 %1274  ;;  %v1270_v6 = vpop.permute.xlu0 %1269 }
 0x1c2   :  { %v1768_v7 = vmul.f32 %v1275_v5, %v172_v1  ;;  %v1767_v8 = vmul.f32 %v1270_v6, %v171_v2  ;;  %1594 = vperm.xlu1 %2070, %v464_v3   ;;  %1589 = vperm.xlu0 %2069, %v463_v4   ;;  %v192_v1 = vld [vmem:[%s4368_s1 + $0x5a8] sm:$0xff]  ;;  %v191_v2 = vld [vmem:[%s4368_s1 + $0x5a0] sm:$0xff] }
 0x1c4   :  { %1997 = vst.msk [vmem:[%s4369_s2 + $0x508] sm:$0xff] %vm1835_vm0, %v1768_v7  ;;  %1996 = vst.msk [vmem:[%s4369_s2 + $0x500] sm:$0xff] %vm1835_vm0, %v1767_v8  ;;  %v194_v7 = vld [vmem:[%s4368_s1 + $0x5b8] sm:$0xff]  ;;  %v193_v8 = vld [vmem:[%s4368_s1 + $0x5b0] sm:$0xff] }
 0x1c5   :  { %v1285_v13 = vpop.permute.xlu1 %1284  ;;  %v1280_v14 = vpop.permute.xlu0 %1279 }
 0x1c6   :  { %v1770_v15 = vmul.f32 %v1285_v13, %v174_v9  ;;  %v1769_v16 = vmul.f32 %v1280_v14, %v173_v10  ;;  %1604 = vperm.xlu1 %2070, %v466_v11   ;;  %1599 = vperm.xlu0 %2069, %v465_v12   ;;  %v196_v13 = vld [vmem:[%s4368_s1 + $0x5c8] sm:$0xff]  ;;  %v195_v14 = vld [vmem:[%s4368_s1 + $0x5c0] sm:$0xff] }
 0x1c8   :  { %1999 = vst.msk [vmem:[%s4369_s2 + $0x518] sm:$0xff] %vm1835_vm0, %v1770_v15  ;;  %1998 = vst.msk [vmem:[%s4369_s2 + $0x510] sm:$0xff] %vm1835_vm0, %v1769_v16 }
 0x1c9   :  { %v1295_v19 = vpop.permute.xlu1 %1294  ;;  %v1290_v20 = vpop.permute.xlu0 %1289 }
 0x1ca   :  { %v1772_v21 = vmul.f32 %v1295_v19, %v176_v17  ;;  %v1771_v22 = vmul.f32 %v1290_v20, %v175_v18  ;;  %v198_v19 = vld [vmem:[%s4368_s1 + $0x5d8] sm:$0xff]  ;;  %v197_v20 = vld [vmem:[%s4368_s1 + $0x5d0] sm:$0xff] }
 0x1cc   :  { %2001 = vst.msk [vmem:[%s4369_s2 + $0x528] sm:$0xff] %vm1835_vm0, %v1772_v21  ;;  %2000 = vst.msk [vmem:[%s4369_s2 + $0x520] sm:$0xff] %vm1835_vm0, %v1771_v22 }
 0x1cd   :  { %v1305_v25 = vpop.permute.xlu1 %1304  ;;  %v1300_v26 = vpop.permute.xlu0 %1299 }
 0x1ce   :  { %v1774_v27 = vmul.f32 %v1305_v25, %v178_v23  ;;  %v1773_v28 = vmul.f32 %v1300_v26, %v177_v24  ;;  %v200_v25 = vld [vmem:[%s4368_s1 + $0x5e8] sm:$0xff]  ;;  %v199_v26 = vld [vmem:[%s4368_s1 + $0x5e0] sm:$0xff] }
 0x1d0   :  { %2003 = vst.msk [vmem:[%s4369_s2 + $0x538] sm:$0xff] %vm1835_vm0, %v1774_v27  ;;  %2002 = vst.msk [vmem:[%s4369_s2 + $0x530] sm:$0xff] %vm1835_vm0, %v1773_v28 }
 0x1d1   :  { %v1315_v31 = vpop.permute.xlu1 %1314  ;;  %v1310_v32 = vpop.permute.xlu0 %1309 }
 0x1d2   :  { %v1776_v33 = vmul.f32 %v1315_v31, %v180_v29  ;;  %v1775_v34 = vmul.f32 %v1310_v32, %v179_v30  ;;  %v202_v31 = vld [vmem:[%s4368_s1 + $0x5f8] sm:$0xff]  ;;  %v201_v32 = vld [vmem:[%s4368_s1 + $0x5f0] sm:$0xff] }
 0x1d4   :  { %2005 = vst.msk [vmem:[%s4369_s2 + $0x548] sm:$0xff] %vm1835_vm0, %v1776_v33  ;;  %2004 = vst.msk [vmem:[%s4369_s2 + $0x540] sm:$0xff] %vm1835_vm0, %v1775_v34 }
 0x1d5   :  { %v1325_v37 = vpop.permute.xlu1 %1324  ;;  %v1320_v38 = vpop.permute.xlu0 %1319 }
 0x1d6   :  { %v1778_v39 = vmul.f32 %v1325_v37, %v182_v35  ;;  %v1777_v40 = vmul.f32 %v1320_v38, %v181_v36  ;;  %v204_v37 = vld [vmem:[%s4368_s1 + $0x608] sm:$0xff]  ;;  %v203_v38 = vld [vmem:[%s4368_s1 + $0x600] sm:$0xff] }
 0x1d8   :  { %2007 = vst.msk [vmem:[%s4369_s2 + $0x558] sm:$0xff] %vm1835_vm0, %v1778_v39  ;;  %2006 = vst.msk [vmem:[%s4369_s2 + $0x550] sm:$0xff] %vm1835_vm0, %v1777_v40 }
 0x1d9   :  { %v1335_v43 = vpop.permute.xlu1 %1334  ;;  %v1330_v44 = vpop.permute.xlu0 %1329 }
 0x1da   :  { %v1780_v45 = vmul.f32 %v1335_v43, %v184_v41  ;;  %v1779_v46 = vmul.f32 %v1330_v44, %v183_v42  ;;  %v206_v43 = vld [vmem:[%s4368_s1 + $0x618] sm:$0xff]  ;;  %v205_v44 = vld [vmem:[%s4368_s1 + $0x610] sm:$0xff] }
 0x1dc   :  { %2009 = vst.msk [vmem:[%s4369_s2 + $0x568] sm:$0xff] %vm1835_vm0, %v1780_v45  ;;  %2008 = vst.msk [vmem:[%s4369_s2 + $0x560] sm:$0xff] %vm1835_vm0, %v1779_v46 }
 0x1dd   :  { %v1345_v49 = vpop.permute.xlu1 %1344  ;;  %v1340_v50 = vpop.permute.xlu0 %1339 }
 0x1de   :  { %v1782_v51 = vmul.f32 %v1345_v49, %v186_v47  ;;  %v1781_v52 = vmul.f32 %v1340_v50, %v185_v48  ;;  %v208_v49 = vld [vmem:[%s4368_s1 + $0x628] sm:$0xff]  ;;  %v207_v50 = vld [vmem:[%s4368_s1 + $0x620] sm:$0xff] }
 0x1e0   :  { %2011 = vst.msk [vmem:[%s4369_s2 + $0x578] sm:$0xff] %vm1835_vm0, %v1782_v51  ;;  %2010 = vst.msk [vmem:[%s4369_s2 + $0x570] sm:$0xff] %vm1835_vm0, %v1781_v52 }
 0x1e1   :  { %v1355_v55 = vpop.permute.xlu1 %1354  ;;  %v1350_v56 = vpop.permute.xlu0 %1349 }
 0x1e2   :  { %v1784_v57 = vmul.f32 %v1355_v55, %v188_v53  ;;  %v1783_v58 = vmul.f32 %v1350_v56, %v187_v54  ;;  %v210_v55 = vld [vmem:[%s4368_s1 + $0x638] sm:$0xff]  ;;  %v209_v56 = vld [vmem:[%s4368_s1 + $0x630] sm:$0xff] }
 0x1e4   :  { %2013 = vst.msk [vmem:[%s4369_s2 + $0x588] sm:$0xff] %vm1835_vm0, %v1784_v57  ;;  %2012 = vst.msk [vmem:[%s4369_s2 + $0x580] sm:$0xff] %vm1835_vm0, %v1783_v58 }
 0x1e5   :  { %v1365_v61 = vpop.permute.xlu1 %1364  ;;  %v1360_v62 = vpop.permute.xlu0 %1359 }
 0x1e6   :  { %v1786_v63 = vmul.f32 %v1365_v61, %v190_v59  ;;  %v1785_v0 = vmul.f32 %v1360_v62, %v189_v60  ;;  %v212_v61 = vld [vmem:[%s4368_s1 + $0x648] sm:$0xff]  ;;  %v211_v62 = vld [vmem:[%s4368_s1 + $0x640] sm:$0xff] }
 0x1e8   :  { %2015 = vst.msk [vmem:[%s4369_s2 + $0x598] sm:$0xff] %vm1835_vm0, %v1786_v63  ;;  %2014 = vst.msk [vmem:[%s4369_s2 + $0x590] sm:$0xff] %vm1835_vm0, %v1785_v0 }
 0x1e9   :  { %v1375_v3 = vpop.permute.xlu1 %1374  ;;  %v1370_v4 = vpop.permute.xlu0 %1369 }
 0x1ea   :  { %v1788_v5 = vmul.f32 %v1375_v3, %v192_v1  ;;  %v1787_v6 = vmul.f32 %v1370_v4, %v191_v2  ;;  %v214_v3 = vld [vmem:[%s4368_s1 + $0x658] sm:$0xff]  ;;  %v213_v4 = vld [vmem:[%s4368_s1 + $0x650] sm:$0xff] }
 0x1ec   :  { %2017 = vst.msk [vmem:[%s4369_s2 + $0x5a8] sm:$0xff] %vm1835_vm0, %v1788_v5  ;;  %2016 = vst.msk [vmem:[%s4369_s2 + $0x5a0] sm:$0xff] %vm1835_vm0, %v1787_v6 }
 0x1ed   :  { %v1385_v9 = vpop.permute.xlu1 %1384  ;;  %v1380_v10 = vpop.permute.xlu0 %1379 }
 0x1ee   :  { %v1790_v11 = vmul.f32 %v1385_v9, %v194_v7  ;;  %v1789_v12 = vmul.f32 %v1380_v10, %v193_v8  ;;  %v216_v9 = vld [vmem:[%s4368_s1 + $0x668] sm:$0xff]  ;;  %v215_v10 = vld [vmem:[%s4368_s1 + $0x660] sm:$0xff] }
 0x1f0   :  { %2019 = vst.msk [vmem:[%s4369_s2 + $0x5b8] sm:$0xff] %vm1835_vm0, %v1790_v11  ;;  %2018 = vst.msk [vmem:[%s4369_s2 + $0x5b0] sm:$0xff] %vm1835_vm0, %v1789_v12 }
 0x1f1   :  { %v1395_v15 = vpop.permute.xlu1 %1394  ;;  %v1390_v16 = vpop.permute.xlu0 %1389 }
 0x1f2   :  { %v1792_v17 = vmul.f32 %v1395_v15, %v196_v13  ;;  %v1791_v18 = vmul.f32 %v1390_v16, %v195_v14  ;;  %v218_v15 = vld [vmem:[%s4368_s1 + $0x678] sm:$0xff]  ;;  %v217_v16 = vld [vmem:[%s4368_s1 + $0x670] sm:$0xff] }
 0x1f4   :  { %2021 = vst.msk [vmem:[%s4369_s2 + $0x5c8] sm:$0xff] %vm1835_vm0, %v1792_v17  ;;  %2020 = vst.msk [vmem:[%s4369_s2 + $0x5c0] sm:$0xff] %vm1835_vm0, %v1791_v18 }
 0x1f5   :  { %v1405_v21 = vpop.permute.xlu1 %1404  ;;  %v1400_v22 = vpop.permute.xlu0 %1399 }
 0x1f6   :  { %v1794_v23 = vmul.f32 %v1405_v21, %v198_v19  ;;  %v1793_v24 = vmul.f32 %v1400_v22, %v197_v20  ;;  %v220_v21 = vld [vmem:[%s4368_s1 + $0x688] sm:$0xff]  ;;  %v219_v22 = vld [vmem:[%s4368_s1 + $0x680] sm:$0xff] }
 0x1f8   :  { %2023 = vst.msk [vmem:[%s4369_s2 + $0x5d8] sm:$0xff] %vm1835_vm0, %v1794_v23  ;;  %2022 = vst.msk [vmem:[%s4369_s2 + $0x5d0] sm:$0xff] %vm1835_vm0, %v1793_v24 }
 0x1f9   :  { %v1415_v27 = vpop.permute.xlu1 %1414  ;;  %v1410_v28 = vpop.permute.xlu0 %1409 }
 0x1fa   :  { %v1796_v29 = vmul.f32 %v1415_v27, %v200_v25  ;;  %v1795_v30 = vmul.f32 %v1410_v28, %v199_v26  ;;  %v222_v27 = vld [vmem:[%s4368_s1 + $0x698] sm:$0xff]  ;;  %v221_v28 = vld [vmem:[%s4368_s1 + $0x690] sm:$0xff] }
 0x1fc   :  { %2025 = vst.msk [vmem:[%s4369_s2 + $0x5e8] sm:$0xff] %vm1835_vm0, %v1796_v29  ;;  %2024 = vst.msk [vmem:[%s4369_s2 + $0x5e0] sm:$0xff] %vm1835_vm0, %v1795_v30 }
 0x1fd   :  { %v1425_v33 = vpop.permute.xlu1 %1424  ;;  %v1420_v34 = vpop.permute.xlu0 %1419 }
 0x1fe   :  { %v1798_v35 = vmul.f32 %v1425_v33, %v202_v31  ;;  %v1797_v36 = vmul.f32 %v1420_v34, %v201_v32  ;;  %v224_v33 = vld [vmem:[%s4368_s1 + $0x6a8] sm:$0xff]  ;;  %v223_v34 = vld [vmem:[%s4368_s1 + $0x6a0] sm:$0xff] }
 0x200   :  { %2027 = vst.msk [vmem:[%s4369_s2 + $0x5f8] sm:$0xff] %vm1835_vm0, %v1798_v35  ;;  %2026 = vst.msk [vmem:[%s4369_s2 + $0x5f0] sm:$0xff] %vm1835_vm0, %v1797_v36 }
 0x201   :  { %v1435_v39 = vpop.permute.xlu1 %1434  ;;  %v1430_v40 = vpop.permute.xlu0 %1429 }
 0x202   :  { %v1800_v41 = vmul.f32 %v1435_v39, %v204_v37  ;;  %v1799_v42 = vmul.f32 %v1430_v40, %v203_v38  ;;  %v226_v39 = vld [vmem:[%s4368_s1 + $0x6b8] sm:$0xff]  ;;  %v225_v40 = vld [vmem:[%s4368_s1 + $0x6b0] sm:$0xff] }
 0x204   :  { %2029 = vst.msk [vmem:[%s4369_s2 + $0x608] sm:$0xff] %vm1835_vm0, %v1800_v41  ;;  %2028 = vst.msk [vmem:[%s4369_s2 + $0x600] sm:$0xff] %vm1835_vm0, %v1799_v42 }
 0x205   :  { %v1445_v45 = vpop.permute.xlu1 %1444  ;;  %v1440_v46 = vpop.permute.xlu0 %1439 }
 0x206   :  { %v1802_v47 = vmul.f32 %v1445_v45, %v206_v43  ;;  %v1801_v48 = vmul.f32 %v1440_v46, %v205_v44  ;;  %v228_v45 = vld [vmem:[%s4368_s1 + $0x6c8] sm:$0xff]  ;;  %v227_v46 = vld [vmem:[%s4368_s1 + $0x6c0] sm:$0xff] }
 0x208   :  { %2031 = vst.msk [vmem:[%s4369_s2 + $0x618] sm:$0xff] %vm1835_vm0, %v1802_v47  ;;  %2030 = vst.msk [vmem:[%s4369_s2 + $0x610] sm:$0xff] %vm1835_vm0, %v1801_v48 }
 0x209   :  { %v1455_v51 = vpop.permute.xlu1 %1454  ;;  %v1450_v52 = vpop.permute.xlu0 %1449 }
 0x20a   :  { %v1804_v53 = vmul.f32 %v1455_v51, %v208_v49  ;;  %v1803_v54 = vmul.f32 %v1450_v52, %v207_v50  ;;  %v230_v51 = vld [vmem:[%s4368_s1 + $0x6d8] sm:$0xff]  ;;  %v229_v52 = vld [vmem:[%s4368_s1 + $0x6d0] sm:$0xff] }
 0x20c   :  { %2033 = vst.msk [vmem:[%s4369_s2 + $0x628] sm:$0xff] %vm1835_vm0, %v1804_v53  ;;  %2032 = vst.msk [vmem:[%s4369_s2 + $0x620] sm:$0xff] %vm1835_vm0, %v1803_v54 }
 0x20d   :  { %v1465_v57 = vpop.permute.xlu1 %1464  ;;  %v1460_v58 = vpop.permute.xlu0 %1459 }
 0x20e   :  { %v1806_v59 = vmul.f32 %v1465_v57, %v210_v55  ;;  %v1805_v60 = vmul.f32 %v1460_v58, %v209_v56  ;;  %v232_v57 = vld [vmem:[%s4368_s1 + $0x6e8] sm:$0xff]  ;;  %v231_v58 = vld [vmem:[%s4368_s1 + $0x6e0] sm:$0xff] }
 0x210   :  { %2035 = vst.msk [vmem:[%s4369_s2 + $0x638] sm:$0xff] %vm1835_vm0, %v1806_v59  ;;  %2034 = vst.msk [vmem:[%s4369_s2 + $0x630] sm:$0xff] %vm1835_vm0, %v1805_v60 }
 0x211   :  { %v1475_v63 = vpop.permute.xlu1 %1474  ;;  %v1470_v0 = vpop.permute.xlu0 %1469 }
 0x212   :  { %v1808_v1 = vmul.f32 %v1475_v63, %v212_v61  ;;  %v1807_v2 = vmul.f32 %v1470_v0, %v211_v62  ;;  %v234_v63 = vld [vmem:[%s4368_s1 + $0x6f8] sm:$0xff]  ;;  %v233_v0 = vld [vmem:[%s4368_s1 + $0x6f0] sm:$0xff] }
 0x214   :  { %2037 = vst.msk [vmem:[%s4369_s2 + $0x648] sm:$0xff] %vm1835_vm0, %v1808_v1  ;;  %2036 = vst.msk [vmem:[%s4369_s2 + $0x640] sm:$0xff] %vm1835_vm0, %v1807_v2 }
 0x215   :  { %v1485_v5 = vpop.permute.xlu1 %1484  ;;  %v1480_v6 = vpop.permute.xlu0 %1479 }
 0x216   :  { %v1810_v7 = vmul.f32 %v1485_v5, %v214_v3  ;;  %v1809_v8 = vmul.f32 %v1480_v6, %v213_v4  ;;  %v236_v5 = vld [vmem:[%s4368_s1 + $0x708] sm:$0xff]  ;;  %v235_v6 = vld [vmem:[%s4368_s1 + $0x700] sm:$0xff] }
 0x218   :  { %2039 = vst.msk [vmem:[%s4369_s2 + $0x658] sm:$0xff] %vm1835_vm0, %v1810_v7  ;;  %2038 = vst.msk [vmem:[%s4369_s2 + $0x650] sm:$0xff] %vm1835_vm0, %v1809_v8 }
 0x219   :  { %v1495_v11 = vpop.permute.xlu1 %1494  ;;  %v1490_v12 = vpop.permute.xlu0 %1489 }
 0x21a   :  { %v1812_v13 = vmul.f32 %v1495_v11, %v216_v9  ;;  %v1811_v14 = vmul.f32 %v1490_v12, %v215_v10  ;;  %v238_v11 = vld [vmem:[%s4368_s1 + $0x718] sm:$0xff]  ;;  %v237_v12 = vld [vmem:[%s4368_s1 + $0x710] sm:$0xff] }
 0x21c   :  { %2041 = vst.msk [vmem:[%s4369_s2 + $0x668] sm:$0xff] %vm1835_vm0, %v1812_v13  ;;  %2040 = vst.msk [vmem:[%s4369_s2 + $0x660] sm:$0xff] %vm1835_vm0, %v1811_v14 }
 0x21d   :  { %v1505_v17 = vpop.permute.xlu1 %1504  ;;  %v1500_v18 = vpop.permute.xlu0 %1499 }
 0x21e   :  { %v1814_v19 = vmul.f32 %v1505_v17, %v218_v15  ;;  %v1813_v20 = vmul.f32 %v1500_v18, %v217_v16 }
 0x220   :  { %2043 = vst.msk [vmem:[%s4369_s2 + $0x678] sm:$0xff] %vm1835_vm0, %v1814_v19  ;;  %2042 = vst.msk [vmem:[%s4369_s2 + $0x670] sm:$0xff] %vm1835_vm0, %v1813_v20 }
 0x221   :  { %v1515_v23 = vpop.permute.xlu1 %1514  ;;  %v1510_v24 = vpop.permute.xlu0 %1509 }
 0x222   :  { %v1816_v25 = vmul.f32 %v1515_v23, %v220_v21  ;;  %v1815_v26 = vmul.f32 %v1510_v24, %v219_v22 }
 0x224   :  { %2045 = vst.msk [vmem:[%s4369_s2 + $0x688] sm:$0xff] %vm1835_vm0, %v1816_v25  ;;  %2044 = vst.msk [vmem:[%s4369_s2 + $0x680] sm:$0xff] %vm1835_vm0, %v1815_v26 }
 0x225   :  { %v1525_v29 = vpop.permute.xlu1 %1524  ;;  %v1520_v30 = vpop.permute.xlu0 %1519 }
 0x226   :  { %v1818_v31 = vmul.f32 %v1525_v29, %v222_v27  ;;  %v1817_v32 = vmul.f32 %v1520_v30, %v221_v28 }
 0x228   :  { %2047 = vst.msk [vmem:[%s4369_s2 + $0x698] sm:$0xff] %vm1835_vm0, %v1818_v31  ;;  %2046 = vst.msk [vmem:[%s4369_s2 + $0x690] sm:$0xff] %vm1835_vm0, %v1817_v32 }
 0x229   :  { %v1535_v35 = vpop.permute.xlu1 %1534  ;;  %v1530_v36 = vpop.permute.xlu0 %1529 }
 0x22a   :  { %v1820_v37 = vmul.f32 %v1535_v35, %v224_v33  ;;  %v1819_v38 = vmul.f32 %v1530_v36, %v223_v34 }
 0x22c   :  { %2049 = vst.msk [vmem:[%s4369_s2 + $0x6a8] sm:$0xff] %vm1835_vm0, %v1820_v37  ;;  %2048 = vst.msk [vmem:[%s4369_s2 + $0x6a0] sm:$0xff] %vm1835_vm0, %v1819_v38 }
 0x22d   :  { %v1545_v41 = vpop.permute.xlu1 %1544  ;;  %v1540_v42 = vpop.permute.xlu0 %1539 }
 0x22e   :  { %v1822_v43 = vmul.f32 %v1545_v41, %v226_v39  ;;  %v1821_v44 = vmul.f32 %v1540_v42, %v225_v40 }
 0x230   :  { %2051 = vst.msk [vmem:[%s4369_s2 + $0x6b8] sm:$0xff] %vm1835_vm0, %v1822_v43  ;;  %2050 = vst.msk [vmem:[%s4369_s2 + $0x6b0] sm:$0xff] %vm1835_vm0, %v1821_v44 }
 0x231   :  { %v1555_v47 = vpop.permute.xlu1 %1554  ;;  %v1550_v48 = vpop.permute.xlu0 %1549 }
 0x232   :  { %v1824_v49 = vmul.f32 %v1555_v47, %v228_v45  ;;  %v1823_v50 = vmul.f32 %v1550_v48, %v227_v46 }
 0x234   :  { %2053 = vst.msk [vmem:[%s4369_s2 + $0x6c8] sm:$0xff] %vm1835_vm0, %v1824_v49  ;;  %2052 = vst.msk [vmem:[%s4369_s2 + $0x6c0] sm:$0xff] %vm1835_vm0, %v1823_v50 }
 0x235   :  { %v1565_v53 = vpop.permute.xlu1 %1564  ;;  %v1560_v54 = vpop.permute.xlu0 %1559 }
 0x236   :  { %v1826_v55 = vmul.f32 %v1565_v53, %v230_v51  ;;  %v1825_v56 = vmul.f32 %v1560_v54, %v229_v52 }
 0x238   :  { %2055 = vst.msk [vmem:[%s4369_s2 + $0x6d8] sm:$0xff] %vm1835_vm0, %v1826_v55  ;;  %2054 = vst.msk [vmem:[%s4369_s2 + $0x6d0] sm:$0xff] %vm1835_vm0, %v1825_v56 }
 0x239   :  { %v1575_v59 = vpop.permute.xlu1 %1574  ;;  %v1570_v60 = vpop.permute.xlu0 %1569 }
 0x23a   :  { %v1828_v61 = vmul.f32 %v1575_v59, %v232_v57  ;;  %v1827_v62 = vmul.f32 %v1570_v60, %v231_v58 }
 0x23c   :  { %2057 = vst.msk [vmem:[%s4369_s2 + $0x6e8] sm:$0xff] %vm1835_vm0, %v1828_v61  ;;  %2056 = vst.msk [vmem:[%s4369_s2 + $0x6e0] sm:$0xff] %vm1835_vm0, %v1827_v62 }
 0x23d   :  { %v1585_v1 = vpop.permute.xlu1 %1584  ;;  %v1580_v2 = vpop.permute.xlu0 %1579 }
 0x23e   :  { %v1830_v3 = vmul.f32 %v1585_v1, %v234_v63  ;;  %v1829_v4 = vmul.f32 %v1580_v2, %v233_v0 }
 0x240   :  { %2059 = vst.msk [vmem:[%s4369_s2 + $0x6f8] sm:$0xff] %vm1835_vm0, %v1830_v3  ;;  %2058 = vst.msk [vmem:[%s4369_s2 + $0x6f0] sm:$0xff] %vm1835_vm0, %v1829_v4 }
 0x241   :  { %v1595_v7 = vpop.permute.xlu1 %1594  ;;  %v1590_v8 = vpop.permute.xlu0 %1589 }
 0x242   :  { %v1832_v9 = vmul.f32 %v1595_v7, %v236_v5  ;;  %v1831_v10 = vmul.f32 %v1590_v8, %v235_v6 }
 0x244   :  { %2061 = vst.msk [vmem:[%s4369_s2 + $0x708] sm:$0xff] %vm1835_vm0, %v1832_v9  ;;  %2060 = vst.msk [vmem:[%s4369_s2 + $0x700] sm:$0xff] %vm1835_vm0, %v1831_v10 }
 0x245   :  { %v1605_v13 = vpop.permute.xlu1 %1604  ;;  %v1600_v14 = vpop.permute.xlu0 %1599 }
 0x246   :  { %v1834_v15 = vmul.f32 %v1605_v13, %v238_v11  ;;  %v1833_v16 = vmul.f32 %v1600_v14, %v237_v12 }
 0x248   :  { %2063 = vst.msk [vmem:[%s4369_s2 + $0x718] sm:$0xff] %vm1835_vm0, %v1834_v15  ;;  %2062 = vst.msk [vmem:[%s4369_s2 + $0x710] sm:$0xff] %vm1835_vm0, %v1833_v16 }

</bundles_post_ra>
